<compile_context>
chip_gen: v7x
topology: tpu7x:2x2x1
jax: 0.10.0
libtpu: 0.0.40
codegen_flags: <defaults>
</compile_context>

<pallas_src>
from functools import partial

import jax
import jax.numpy as jnp
from jax import lax
from jax.experimental import pallas as pl
from jax.experimental.pallas import tpu as pltpu


def _round_up(x, m):
    return ((x + m - 1) // m) * m


def _cumulant_euler_kernel(T, n_steps, unroll,
                           t_ref,       # VMEM (Ns_pad, 1)        f32  times[:-1] (zero padded)
                           dt_ref,      # VMEM (Ns_pad, 1)        f32  dt per step (zero padded)
                           js_ref,      # VMEM (1, E)             f32
                           vs_t_ref,    # VMEM (nb, F)            f32  vs transposed
                           w_ref,       # VMEM (E, Dp, Dp)        f32  coupling operators (padded)
                           bstack_ref,  # VMEM (Dp, F*Dp)         f32  [B_0 | B_1 | ...] (padded)
                           x0_ref,      # VMEM (1, Dp)            f32
                           out_ref,     # VMEM (1, Dp)            f32
                           m_scr,       # VMEM (Dp, (1+F)*Dp)     f32  stacked operator
                           coef_scr):   # VMEM (Ns_pad, (1+F)*Dp) f32  per-step dt/drive coeffs
    E, Dp, _ = w_ref.shape
    nb, F = vs_t_ref.shape
    NB = 1 + F  # number of Dp-wide blocks in the stacked operator

    # ---------------- prologue (runs once) ----------------
    # J(i) = 2*sigmoid(Js[i]) - 1  (exact CumulantNN.J semantics)
    jvals = 2.0 * jax.nn.sigmoid(js_ref[...]) - 1.0                       # (1, E)

    # Time-independent block: base = sum_e J_e * W_e  (E small, unrolled, prologue-only)
    base = jnp.zeros((Dp, Dp), jnp.float32)
    for e in range(E):
        base = base + jvals[:, e:e + 1] * w_ref[e]
    m_scr[:, :Dp] = base
    m_scr[:, Dp:] = bstack_ref[...]                                       # [B_0 | ... | B_{F-1}]

    # Drives for every step: p_f(t_n) = 2*sigmoid( sum_k vs[f,k]*cos(2*pi*(t_n/T)*k) ) - 1
    k = lax.broadcasted_iota(jnp.int32, (1, nb), 1).astype(jnp.float32)   # (1, nb)
    cos_tab = jnp.cos((2.0 * jnp.pi / T) * t_ref[...] * k)                # (Ns_pad, nb)
    u = jnp.dot(cos_tab, vs_t_ref[...], preferred_element_type=jnp.float32)  # (Ns_pad, F)
    p_all = 2.0 * jax.nn.sigmoid(u) - 1.0                                 # (Ns_pad, F)

    # coef[n] = dt_n * [1 (Dp lanes) | p_0 (Dp lanes) | ... | p_{F-1} (Dp lanes)]
    lane_ones = jnp.ones((1, Dp), jnp.float32)
    dt_col = dt_ref[...]                                                  # (Ns_pad, 1)
    coef_scr[:, :Dp] = dt_col * lane_ones
    for f in range(F):
        coef_scr[:, (f + 1) * Dp:(f + 2) * Dp] = (dt_col * p_all[:, f:f + 1]) * lane_ones

    # ---------------- serial Euler loop ----------------
    # x <- x + dt * (x @ (base + sum_f p_f B_f))  ==  x + sum_blocks( (x @ M_stack) * coef[n] )
    def step(n, x):
        y = jnp.dot(x, m_scr[...], preferred_element_type=jnp.float32)    # (1, NB*Dp) one MXU push
        yc = y * coef_scr[pl.ds(n, 1), :]                                 # (1, NB*Dp)
        dx = yc[:, :Dp]
        for f in range(1, NB):                                            # NB-1 aligned AXPYs
            dx = dx + yc[:, f * Dp:(f + 1) * Dp]
        return x + dx

    x_final = lax.fori_loop(0, n_steps, step, x0_ref[...], unroll=unroll)
    out_ref[...] = x_final.astype(out_ref.dtype)


def cumulant_nn_forward(times, Js, vs, W, B, x0, T=1.0):
    """Pallas implementation of CumulantNN.forward(times) -> x(t_final)."""
    E, D, _ = W.shape
    F, nb = vs.shape
    n_steps = int(times.shape[0]) - 1

    Dp = _round_up(max(D, 1), 128)          # lane-aligned state width
    Ns_pad = _round_up(max(n_steps, 1), 8)  # sublane-aligned step table

    f32 = jnp.float32
    # Zero-pad operators / state to the aligned width (padded rows/cols stay 0 through the ODE).
    W_pad = jnp.zeros((E, Dp, Dp), f32).at[:, :D, :D].set(W.astype(f32))
    B_pad = jnp.zeros((F, Dp, Dp), f32).at[:, :D, :D].set(B.astype(f32))
    # Horizontal stack [B_0 | B_1 | ... | B_{F-1}] of shape (Dp, F*Dp).
    b_stack = jnp.transpose(B_pad, (1, 0, 2)).reshape(Dp, F * Dp)
    x0_pad = jnp.zeros((1, Dp), f32).at[0, :D].set(x0.astype(f32))

    t = times.astype(f32)
    t_col = jnp.zeros((Ns_pad, 1), f32).at[:n_steps, 0].set(t[:-1])
    dt_col = jnp.zeros((Ns_pad, 1), f32).at[:n_steps, 0].set(t[1:] - t[:-1])

    unroll = True if n_steps <= 32 else 8   # full unroll for small grids, partial otherwise
    kernel = partial(_cumulant_euler_kernel, float(T), n_steps, unroll)

    out = pl.pallas_call(
        kernel,
        out_shape=jax.ShapeDtypeStruct((1, Dp), f32),
        in_specs=[pl.BlockSpec(memory_space=pltpu.MemorySpace.VMEM)] * 7,
        out_specs=pl.BlockSpec(memory_space=pltpu.MemorySpace.VMEM),
        scratch_shapes=[
            pltpu.VMEM((Dp, (1 + F) * Dp), f32),       # stacked operator M_stack
            pltpu.VMEM((Ns_pad, (1 + F) * Dp), f32),   # per-step dt/drive coefficient table
        ],
    )(t_col, dt_col,
      Js.reshape(1, E).astype(f32),
      vs.astype(f32).T,
      W_pad, b_stack, x0_pad)
    return out[0, :D]


def reference_forward(times, Js, vs, W, B, x0, T=1.0):
    """Pure-JAX reference with identical semantics."""
    jvals = 2.0 * jax.nn.sigmoid(Js) - 1.0
    base = jnp.einsum('e,eij->ij', jvals, W)
    k = jnp.arange(vs.shape[1], dtype=jnp.float32)
    x = x0.astype(jnp.float32)
    for n in range(times.shape[0] - 1):
        t = times[n]
        dt = times[n + 1] - t
        u = vs @ jnp.cos(2.0 * jnp.pi * (t / T) * k)
        p = 2.0 * jax.nn.sigmoid(u) - 1.0
        m = base + jnp.einsum('f,fij->ij', p, B)
        x = x + dt * (x @ m)
    return x


def exps_to_vect(single_exp, edges):
    """CumulantNN.exps_to_vect analogue: first-order Bloch components per qubit,
    followed by second-order products for each graph edge."""
    se = jnp.asarray(single_exp, jnp.float32)                  # (N, 3)
    first = se.reshape(-1)                                     # (3N,)
    secs = [jnp.outer(se[i], se[j]).reshape(-1) for (i, j) in edges]
    return jnp.concatenate([first] + secs)                     # (3N + 9E,)


if __name__ == "__main__":
    # Small synthetic instance mirroring __init__: N qubits on a ring graph,
    # one drive field per qubit, Fourier basis with n_basis=5, T=1.0.
    N = 4
    edges = [(0, 1), (1, 2), (2, 3), (3, 0)]                   # self.Graph
    E = len(edges)
    F = N                                                      # self.Fields
    n_basis = 5
    T = 1.0
    D = 3 * N + 9 * E                                          # len(self.varmap) = 48

    key = jax.random.PRNGKey(0)
    k_js, k_vs, k_w, k_b = jax.random.split(key, 4)

    # nn.Parameter(torch.rand(...)) analogues (deterministic, uniform [0,1))
    Js = jax.random.uniform(k_js, (E,), jnp.float32)
    vs = jax.random.uniform(k_vs, (F, n_basis), jnp.float32)

    # TODO(synk): stand-in deterministic generator tensors for the file-defined equations.
    scale = 0.3 / jnp.sqrt(jnp.float32(D))
    W = scale * jax.random.normal(k_w, (E, D, D), jnp.float32)
    B = scale * jax.random.normal(k_b, (F, D, D), jnp.float32)

    # x0 from exps_to_vect([[0,0,1]]*N)
    x0 = exps_to_vect([[0.0, 0.0, 1.0]] * N, edges)

    # Time grid (fixed-step Euler steps exactly on these points).
    times = jnp.linspace(0.0, T, 8).astype(jnp.float32)

    out = cumulant_nn_forward(times, Js, vs, W, B, x0, T=T)
    out = jax.block_until_ready(out)

    ref = reference_forward(times, Js, vs, W, B, x0, T=T)
    assert out.shape == (D,)
    assert jnp.all(jnp.isfinite(out))
    # Note: in-kernel f32 dots use the default MXU decomposition; loose tolerance is intended.
    assert jnp.allclose(out, ref, atol=1e-2, rtol=1e-2), (out, ref)

    print("KERNEL_OK")
</pallas_src>

<mosaic_0001>
module attributes {stable_mosaic.version = 11 : i64} {
  func.func @_cumulant_euler_kernel(%arg0: memref<8x1xf32, #tpu.memory_space<vmem>>, %arg1: memref<8x1xf32, #tpu.memory_space<vmem>>, %arg2: memref<1x4xf32, #tpu.memory_space<vmem>>, %arg3: memref<5x4xf32, #tpu.memory_space<vmem>>, %arg4: memref<4x128x128xf32, #tpu.memory_space<vmem>>, %arg5: memref<128x512xf32, #tpu.memory_space<vmem>>, %arg6: memref<1x128xf32, #tpu.memory_space<vmem>>, %arg7: memref<1x128xf32, #tpu.memory_space<vmem>>, %arg8: memref<128x640xf32, #tpu.memory_space<vmem>>, %arg9: memref<8x640xf32, #tpu.memory_space<vmem>>) attributes {dimension_semantics = [], scalar_prefetch = 0 : i64, scratch_operands = 2 : i64, tpu.core_type = #tpu.core_type<tc>} {
    %c0 = arith.constant 0 : index
    %c0_0 = arith.constant 0 : index
    %0 = vector.load %arg2[%c0, %c0_0] : memref<1x4xf32, #tpu.memory_space<vmem>>, vector<1x4xf32>
    %1 = arith.negf %0 : vector<1x4xf32>
    %2 = math.exp %1 : vector<1x4xf32>
    %cst = arith.constant 1.000000e+00 : f32
    %3 = vector.broadcast %cst : f32 to vector<1x4xf32>
    %4 = arith.addf %3, %2 : vector<1x4xf32>
    %5 = arith.divf %3, %4 : vector<1x4xf32>
    %cst_1 = arith.constant 2.000000e+00 : f32
    %6 = vector.broadcast %cst_1 : f32 to vector<1x4xf32>
    %7 = arith.mulf %6, %5 : vector<1x4xf32>
    %cst_2 = arith.constant 1.000000e+00 : f32
    %8 = vector.broadcast %cst_2 : f32 to vector<1x4xf32>
    %9 = arith.subf %7, %8 : vector<1x4xf32>
    %cst_3 = arith.constant 0.000000e+00 : f32
    %10 = vector.broadcast %cst_3 : f32 to vector<128x128xf32>
    %11 = vector.extract_strided_slice %9 {offsets = [0, 0], sizes = [1, 1], strides = [1, 1]} : vector<1x4xf32> to vector<1x1xf32>
    %c0_4 = arith.constant 0 : index
    %c0_5 = arith.constant 0 : index
    %c0_6 = arith.constant 0 : index
    %12 = vector.load %arg4[%c0_4, %c0_5, %c0_6] : memref<4x128x128xf32, #tpu.memory_space<vmem>>, vector<1x128x128xf32>
    %13 = vector.shape_cast %12 : vector<1x128x128xf32> to vector<128x128xf32>
    %14 = vector.broadcast %11 : vector<1x1xf32> to vector<128x128xf32>
    %15 = arith.mulf %14, %13 : vector<128x128xf32>
    %16 = arith.addf %10, %15 : vector<128x128xf32>
    %17 = vector.extract_strided_slice %9 {offsets = [0, 1], sizes = [1, 1], strides = [1, 1]} : vector<1x4xf32> to vector<1x1xf32>
    %c1 = arith.constant 1 : index
    %c0_7 = arith.constant 0 : index
    %c0_8 = arith.constant 0 : index
    %18 = vector.load %arg4[%c1, %c0_7, %c0_8] : memref<4x128x128xf32, #tpu.memory_space<vmem>>, vector<1x128x128xf32>
    %19 = vector.shape_cast %18 : vector<1x128x128xf32> to vector<128x128xf32>
    %20 = vector.broadcast %17 : vector<1x1xf32> to vector<128x128xf32>
    %21 = arith.mulf %20, %19 : vector<128x128xf32>
    %22 = arith.addf %16, %21 : vector<128x128xf32>
    %23 = vector.extract_strided_slice %9 {offsets = [0, 2], sizes = [1, 1], strides = [1, 1]} : vector<1x4xf32> to vector<1x1xf32>
    %c2 = arith.constant 2 : index
    %c0_9 = arith.constant 0 : index
    %c0_10 = arith.constant 0 : index
    %24 = vector.load %arg4[%c2, %c0_9, %c0_10] : memref<4x128x128xf32, #tpu.memory_space<vmem>>, vector<1x128x128xf32>
    %25 = vector.shape_cast %24 : vector<1x128x128xf32> to vector<128x128xf32>
    %26 = vector.broadcast %23 : vector<1x1xf32> to vector<128x128xf32>
    %27 = arith.mulf %26, %25 : vector<128x128xf32>
    %28 = arith.addf %22, %27 : vector<128x128xf32>
    %29 = vector.extract_strided_slice %9 {offsets = [0, 3], sizes = [1, 1], strides = [1, 1]} : vector<1x4xf32> to vector<1x1xf32>
    %c3 = arith.constant 3 : index
    %c0_11 = arith.constant 0 : index
    %c0_12 = arith.constant 0 : index
    %30 = vector.load %arg4[%c3, %c0_11, %c0_12] : memref<4x128x128xf32, #tpu.memory_space<vmem>>, vector<1x128x128xf32>
    %31 = vector.shape_cast %30 : vector<1x128x128xf32> to vector<128x128xf32>
    %32 = vector.broadcast %29 : vector<1x1xf32> to vector<128x128xf32>
    %33 = arith.mulf %32, %31 : vector<128x128xf32>
    %34 = arith.addf %28, %33 : vector<128x128xf32>
    %c0_13 = arith.constant 0 : index
    %c0_14 = arith.constant 0 : index
    %35 = vector.load %arg8[%c0_13, %c0_14] : memref<128x640xf32, #tpu.memory_space<vmem>>, vector<128x128xf32>
    tpu.vector_store %arg8[%c0_13, %c0_14], %34 {strides = array<i32>} : memref<128x640xf32, #tpu.memory_space<vmem>>, vector<128x128xf32>,
    %c0_15 = arith.constant 0 : index
    %c0_16 = arith.constant 0 : index
    %36 = vector.load %arg5[%c0_15, %c0_16] : memref<128x512xf32, #tpu.memory_space<vmem>>, vector<128x512xf32>
    %c0_17 = arith.constant 0 : index
    %c128 = arith.constant 128 : index
    %37 = vector.load %arg8[%c0_17, %c128] : memref<128x640xf32, #tpu.memory_space<vmem>>, vector<128x512xf32>
    tpu.vector_store %arg8[%c0_17, %c128], %36 {strides = array<i32>} : memref<128x640xf32, #tpu.memory_space<vmem>>, vector<128x512xf32>,
    %38 = tpu.iota {dimensions = array<i32: 1>} : vector<1x5xi32>
    %39 = arith.sitofp %38 : vector<1x5xi32> to vector<1x5xf32>
    %c0_18 = arith.constant 0 : index
    %c0_19 = arith.constant 0 : index
    %40 = vector.load %arg0[%c0_18, %c0_19] : memref<8x1xf32, #tpu.memory_space<vmem>>, vector<8x1xf32>
    %cst_20 = arith.constant 6.28318548 : f32
    %41 = vector.broadcast %cst_20 : f32 to vector<8x1xf32>
    %42 = arith.mulf %41, %40 : vector<8x1xf32>
    %43 = vector.broadcast %42 : vector<8x1xf32> to vector<8x5xf32>
    %44 = vector.broadcast %39 : vector<1x5xf32> to vector<8x5xf32>
    %45 = arith.mulf %43, %44 : vector<8x5xf32>
    %46 = math.cos %45 : vector<8x5xf32>
    %c0_21 = arith.constant 0 : index
    %c0_22 = arith.constant 0 : index
    %47 = vector.load %arg3[%c0_21, %c0_22] : memref<5x4xf32, #tpu.memory_space<vmem>>, vector<5x4xf32>
    %cst_23 = arith.constant dense<0.000000e+00> : vector<8x4xf32>
    %48 = tpu.matmul %46, %47, %cst_23 {dimension_numbers = #tpu.dot_dimension_numbers<[1], [0], [0], [1], [0, 0, 1, 1], [], []>} : vector<8x5xf32>, vector<5x4xf32>, vector<8x4xf32> -> vector<8x4xf32>
    %49 = arith.negf %48 : vector<8x4xf32>
    %50 = math.exp %49 : vector<8x4xf32>
    %cst_24 = arith.constant 1.000000e+00 : f32
    %51 = vector.broadcast %cst_24 : f32 to vector<8x4xf32>
    %52 = arith.addf %51, %50 : vector<8x4xf32>
    %53 = arith.divf %51, %52 : vector<8x4xf32>
    %cst_25 = arith.constant 2.000000e+00 : f32
    %54 = vector.broadcast %cst_25 : f32 to vector<8x4xf32>
    %55 = arith.mulf %54, %53 : vector<8x4xf32>
    %cst_26 = arith.constant 1.000000e+00 : f32
    %56 = vector.broadcast %cst_26 : f32 to vector<8x4xf32>
    %57 = arith.subf %55, %56 : vector<8x4xf32>
    %cst_27 = arith.constant 1.000000e+00 : f32
    %58 = vector.broadcast %cst_27 : f32 to vector<1x128xf32>
    %c0_28 = arith.constant 0 : index
    %c0_29 = arith.constant 0 : index
    %59 = vector.load %arg1[%c0_28, %c0_29] : memref<8x1xf32, #tpu.memory_space<vmem>>, vector<8x1xf32>
    %60 = vector.broadcast %59 : vector<8x1xf32> to vector<8x128xf32>
    %61 = vector.broadcast %58 : vector<1x128xf32> to vector<8x128xf32>
    %62 = arith.mulf %60, %61 : vector<8x128xf32>
    %c0_30 = arith.constant 0 : index
    %c0_31 = arith.constant 0 : index
    %63 = vector.load %arg9[%c0_30, %c0_31] : memref<8x640xf32, #tpu.memory_space<vmem>>, vector<8x128xf32>
    tpu.vector_store %arg9[%c0_30, %c0_31], %62 {strides = array<i32>} : memref<8x640xf32, #tpu.memory_space<vmem>>, vector<8x128xf32>,
    %64 = vector.extract_strided_slice %57 {offsets = [0, 0], sizes = [8, 1], strides = [1, 1]} : vector<8x4xf32> to vector<8x1xf32>
    %65 = arith.mulf %59, %64 : vector<8x1xf32>
    %66 = vector.broadcast %65 : vector<8x1xf32> to vector<8x128xf32>
    %67 = vector.broadcast %58 : vector<1x128xf32> to vector<8x128xf32>
    %68 = arith.mulf %66, %67 : vector<8x128xf32>
    %c0_32 = arith.constant 0 : index
    %c128_33 = arith.constant 128 : index
    %69 = vector.load %arg9[%c0_32, %c128_33] : memref<8x640xf32, #tpu.memory_space<vmem>>, vector<8x128xf32>
    tpu.vector_store %arg9[%c0_32, %c128_33], %68 {strides = array<i32>} : memref<8x640xf32, #tpu.memory_space<vmem>>, vector<8x128xf32>,
    %70 = vector.extract_strided_slice %57 {offsets = [0, 1], sizes = [8, 1], strides = [1, 1]} : vector<8x4xf32> to vector<8x1xf32>
    %71 = arith.mulf %59, %70 : vector<8x1xf32>
    %72 = vector.broadcast %71 : vector<8x1xf32> to vector<8x128xf32>
    %73 = vector.broadcast %58 : vector<1x128xf32> to vector<8x128xf32>
    %74 = arith.mulf %72, %73 : vector<8x128xf32>
    %c0_34 = arith.constant 0 : index
    %c256 = arith.constant 256 : index
    %75 = vector.load %arg9[%c0_34, %c256] : memref<8x640xf32, #tpu.memory_space<vmem>>, vector<8x128xf32>
    tpu.vector_store %arg9[%c0_34, %c256], %74 {strides = array<i32>} : memref<8x640xf32, #tpu.memory_space<vmem>>, vector<8x128xf32>,
    %76 = vector.extract_strided_slice %57 {offsets = [0, 2], sizes = [8, 1], strides = [1, 1]} : vector<8x4xf32> to vector<8x1xf32>
    %77 = arith.mulf %59, %76 : vector<8x1xf32>
    %78 = vector.broadcast %77 : vector<8x1xf32> to vector<8x128xf32>
    %79 = vector.broadcast %58 : vector<1x128xf32> to vector<8x128xf32>
    %80 = arith.mulf %78, %79 : vector<8x128xf32>
    %c0_35 = arith.constant 0 : index
    %c384 = arith.constant 384 : index
    %81 = vector.load %arg9[%c0_35, %c384] : memref<8x640xf32, #tpu.memory_space<vmem>>, vector<8x128xf32>
    tpu.vector_store %arg9[%c0_35, %c384], %80 {strides = array<i32>} : memref<8x640xf32, #tpu.memory_space<vmem>>, vector<8x128xf32>,
    %82 = vector.extract_strided_slice %57 {offsets = [0, 3], sizes = [8, 1], strides = [1, 1]} : vector<8x4xf32> to vector<8x1xf32>
    %83 = arith.mulf %59, %82 : vector<8x1xf32>
    %84 = vector.broadcast %83 : vector<8x1xf32> to vector<8x128xf32>
    %85 = vector.broadcast %58 : vector<1x128xf32> to vector<8x128xf32>
    %86 = arith.mulf %84, %85 : vector<8x128xf32>
    %c0_36 = arith.constant 0 : index
    %c512 = arith.constant 512 : index
    %87 = vector.load %arg9[%c0_36, %c512] : memref<8x640xf32, #tpu.memory_space<vmem>>, vector<8x128xf32>
    tpu.vector_store %arg9[%c0_36, %c512], %86 {strides = array<i32>} : memref<8x640xf32, #tpu.memory_space<vmem>>, vector<8x128xf32>,
    %c0_37 = arith.constant 0 : index
    %c0_38 = arith.constant 0 : index
    %88 = vector.load %arg6[%c0_37, %c0_38] : memref<1x128xf32, #tpu.memory_space<vmem>>, vector<1x128xf32>
    %c0_i32 = arith.constant 0 : i32
    %c0_39 = arith.constant 0 : index
    %c0_40 = arith.constant 0 : index
    %89 = vector.load %arg8[%c0_39, %c0_40] : memref<128x640xf32, #tpu.memory_space<vmem>>, vector<128x640xf32>
    %cst_41 = arith.constant dense<0.000000e+00> : vector<1x640xf32>
    %90 = tpu.matmul %88, %89, %cst_41 {dimension_numbers = #tpu.dot_dimension_numbers<[1], [0], [0], [1], [0, 0, 1, 1], [], []>} : vector<1x128xf32>, vector<128x640xf32>, vector<1x640xf32> -> vector<1x640xf32>
    %91 = arith.index_cast %c0_i32 : i32 to index
    %c0_42 = arith.constant 0 : index
    %92 = vector.load %arg9[%91, %c0_42] : memref<8x640xf32, #tpu.memory_space<vmem>>, vector<1x640xf32>
    %93 = arith.mulf %90, %92 : vector<1x640xf32>
    %94 = vector.extract_strided_slice %93 {offsets = [0, 0], sizes = [1, 128], strides = [1, 1]} : vector<1x640xf32> to vector<1x128xf32>
    %95 = vector.extract_strided_slice %93 {offsets = [0, 128], sizes = [1, 128], strides = [1, 1]} : vector<1x640xf32> to vector<1x128xf32>
    %96 = arith.addf %94, %95 : vector<1x128xf32>
    %97 = vector.extract_strided_slice %93 {offsets = [0, 256], sizes = [1, 128], strides = [1, 1]} : vector<1x640xf32> to vector<1x128xf32>
    %98 = arith.addf %96, %97 : vector<1x128xf32>
    %99 = vector.extract_strided_slice %93 {offsets = [0, 384], sizes = [1, 128], strides = [1, 1]} : vector<1x640xf32> to vector<1x128xf32>
    %100 = arith.addf %98, %99 : vector<1x128xf32>
    %101 = vector.extract_strided_slice %93 {offsets = [0, 512], sizes = [1, 128], strides = [1, 1]} : vector<1x640xf32> to vector<1x128xf32>
    %102 = arith.addf %100, %101 : vector<1x128xf32>
    %103 = arith.addf %88, %102 : vector<1x128xf32>
    %c1_i32 = arith.constant 1 : i32
    %c0_43 = arith.constant 0 : index
    %c0_44 = arith.constant 0 : index
    %104 = vector.load %arg8[%c0_43, %c0_44] : memref<128x640xf32, #tpu.memory_space<vmem>>, vector<128x640xf32>
    %cst_45 = arith.constant dense<0.000000e+00> : vector<1x640xf32>
    %105 = tpu.matmul %103, %104, %cst_45 {dimension_numbers = #tpu.dot_dimension_numbers<[1], [0], [0], [1], [0, 0, 1, 1], [], []>} : vector<1x128xf32>, vector<128x640xf32>, vector<1x640xf32> -> vector<1x640xf32>
    %106 = arith.index_cast %c1_i32 : i32 to index
    %c0_46 = arith.constant 0 : index
    %107 = vector.load %arg9[%106, %c0_46] : memref<8x640xf32, #tpu.memory_space<vmem>>, vector<1x640xf32>
    %108 = arith.mulf %105, %107 : vector<1x640xf32>
    %109 = vector.extract_strided_slice %108 {offsets = [0, 0], sizes = [1, 128], strides = [1, 1]} : vector<1x640xf32> to vector<1x128xf32>
    %110 = vector.extract_strided_slice %108 {offsets = [0, 128], sizes = [1, 128], strides = [1, 1]} : vector<1x640xf32> to vector<1x128xf32>
    %111 = arith.addf %109, %110 : vector<1x128xf32>
    %112 = vector.extract_strided_slice %108 {offsets = [0, 256], sizes = [1, 128], strides = [1, 1]} : vector<1x640xf32> to vector<1x128xf32>
    %113 = arith.addf %111, %112 : vector<1x128xf32>
    %114 = vector.extract_strided_slice %108 {offsets = [0, 384], sizes = [1, 128], strides = [1, 1]} : vector<1x640xf32> to vector<1x128xf32>
    %115 = arith.addf %113, %114 : vector<1x128xf32>
    %116 = vector.extract_strided_slice %108 {offsets = [0, 512], sizes = [1, 128], strides = [1, 1]} : vector<1x640xf32> to vector<1x128xf32>
    %117 = arith.addf %115, %116 : vector<1x128xf32>
    %118 = arith.addf %103, %117 : vector<1x128xf32>
    %c2_i32 = arith.constant 2 : i32
    %c0_47 = arith.constant 0 : index
    %c0_48 = arith.constant 0 : index
    %119 = vector.load %arg8[%c0_47, %c0_48] : memref<128x640xf32, #tpu.memory_space<vmem>>, vector<128x640xf32>
    %cst_49 = arith.constant dense<0.000000e+00> : vector<1x640xf32>
    %120 = tpu.matmul %118, %119, %cst_49 {dimension_numbers = #tpu.dot_dimension_numbers<[1], [0], [0], [1], [0, 0, 1, 1], [], []>} : vector<1x128xf32>, vector<128x640xf32>, vector<1x640xf32> -> vector<1x640xf32>
    %121 = arith.index_cast %c2_i32 : i32 to index
    %c0_50 = arith.constant 0 : index
    %122 = vector.load %arg9[%121, %c0_50] : memref<8x640xf32, #tpu.memory_space<vmem>>, vector<1x640xf32>
    %123 = arith.mulf %120, %122 : vector<1x640xf32>
    %124 = vector.extract_strided_slice %123 {offsets = [0, 0], sizes = [1, 128], strides = [1, 1]} : vector<1x640xf32> to vector<1x128xf32>
    %125 = vector.extract_strided_slice %123 {offsets = [0, 128], sizes = [1, 128], strides = [1, 1]} : vector<1x640xf32> to vector<1x128xf32>
    %126 = arith.addf %124, %125 : vector<1x128xf32>
    %127 = vector.extract_strided_slice %123 {offsets = [0, 256], sizes = [1, 128], strides = [1, 1]} : vector<1x640xf32> to vector<1x128xf32>
    %128 = arith.addf %126, %127 : vector<1x128xf32>
    %129 = vector.extract_strided_slice %123 {offsets = [0, 384], sizes = [1, 128], strides = [1, 1]} : vector<1x640xf32> to vector<1x128xf32>
    %130 = arith.addf %128, %129 : vector<1x128xf32>
    %131 = vector.extract_strided_slice %123 {offsets = [0, 512], sizes = [1, 128], strides = [1, 1]} : vector<1x640xf32> to vector<1x128xf32>
    %132 = arith.addf %130, %131 : vector<1x128xf32>
    %133 = arith.addf %118, %132 : vector<1x128xf32>
    %c3_i32 = arith.constant 3 : i32
    %c0_51 = arith.constant 0 : index
    %c0_52 = arith.constant 0 : index
    %134 = vector.load %arg8[%c0_51, %c0_52] : memref<128x640xf32, #tpu.memory_space<vmem>>, vector<128x640xf32>
    %cst_53 = arith.constant dense<0.000000e+00> : vector<1x640xf32>
    %135 = tpu.matmul %133, %134, %cst_53 {dimension_numbers = #tpu.dot_dimension_numbers<[1], [0], [0], [1], [0, 0, 1, 1], [], []>} : vector<1x128xf32>, vector<128x640xf32>, vector<1x640xf32> -> vector<1x640xf32>
    %136 = arith.index_cast %c3_i32 : i32 to index
    %c0_54 = arith.constant 0 : index
    %137 = vector.load %arg9[%136, %c0_54] : memref<8x640xf32, #tpu.memory_space<vmem>>, vector<1x640xf32>
    %138 = arith.mulf %135, %137 : vector<1x640xf32>
    %139 = vector.extract_strided_slice %138 {offsets = [0, 0], sizes = [1, 128], strides = [1, 1]} : vector<1x640xf32> to vector<1x128xf32>
    %140 = vector.extract_strided_slice %138 {offsets = [0, 128], sizes = [1, 128], strides = [1, 1]} : vector<1x640xf32> to vector<1x128xf32>
    %141 = arith.addf %139, %140 : vector<1x128xf32>
    %142 = vector.extract_strided_slice %138 {offsets = [0, 256], sizes = [1, 128], strides = [1, 1]} : vector<1x640xf32> to vector<1x128xf32>
    %143 = arith.addf %141, %142 : vector<1x128xf32>
    %144 = vector.extract_strided_slice %138 {offsets = [0, 384], sizes = [1, 128], strides = [1, 1]} : vector<1x640xf32> to vector<1x128xf32>
    %145 = arith.addf %143, %144 : vector<1x128xf32>
    %146 = vector.extract_strided_slice %138 {offsets = [0, 512], sizes = [1, 128], strides = [1, 1]} : vector<1x640xf32> to vector<1x128xf32>
    %147 = arith.addf %145, %146 : vector<1x128xf32>
    %148 = arith.addf %133, %147 : vector<1x128xf32>
    %c4_i32 = arith.constant 4 : i32
    %c0_55 = arith.constant 0 : index
    %c0_56 = arith.constant 0 : index
    %149 = vector.load %arg8[%c0_55, %c0_56] : memref<128x640xf32, #tpu.memory_space<vmem>>, vector<128x640xf32>
    %cst_57 = arith.constant dense<0.000000e+00> : vector<1x640xf32>
    %150 = tpu.matmul %148, %149, %cst_57 {dimension_numbers = #tpu.dot_dimension_numbers<[1], [0], [0], [1], [0, 0, 1, 1], [], []>} : vector<1x128xf32>, vector<128x640xf32>, vector<1x640xf32> -> vector<1x640xf32>
    %151 = arith.index_cast %c4_i32 : i32 to index
    %c0_58 = arith.constant 0 : index
    %152 = vector.load %arg9[%151, %c0_58] : memref<8x640xf32, #tpu.memory_space<vmem>>, vector<1x640xf32>
    %153 = arith.mulf %150, %152 : vector<1x640xf32>
    %154 = vector.extract_strided_slice %153 {offsets = [0, 0], sizes = [1, 128], strides = [1, 1]} : vector<1x640xf32> to vector<1x128xf32>
    %155 = vector.extract_strided_slice %153 {offsets = [0, 128], sizes = [1, 128], strides = [1, 1]} : vector<1x640xf32> to vector<1x128xf32>
    %156 = arith.addf %154, %155 : vector<1x128xf32>
    %157 = vector.extract_strided_slice %153 {offsets = [0, 256], sizes = [1, 128], strides = [1, 1]} : vector<1x640xf32> to vector<1x128xf32>
    %158 = arith.addf %156, %157 : vector<1x128xf32>
    %159 = vector.extract_strided_slice %153 {offsets = [0, 384], sizes = [1, 128], strides = [1, 1]} : vector<1x640xf32> to vector<1x128xf32>
    %160 = arith.addf %158, %159 : vector<1x128xf32>
    %161 = vector.extract_strided_slice %153 {offsets = [0, 512], sizes = [1, 128], strides = [1, 1]} : vector<1x640xf32> to vector<1x128xf32>
    %162 = arith.addf %160, %161 : vector<1x128xf32>
    %163 = arith.addf %148, %162 : vector<1x128xf32>
    %c5_i32 = arith.constant 5 : i32
    %c0_59 = arith.constant 0 : index
    %c0_60 = arith.constant 0 : index
    %164 = vector.load %arg8[%c0_59, %c0_60] : memref<128x640xf32, #tpu.memory_space<vmem>>, vector<128x640xf32>
    %cst_61 = arith.constant dense<0.000000e+00> : vector<1x640xf32>
    %165 = tpu.matmul %163, %164, %cst_61 {dimension_numbers = #tpu.dot_dimension_numbers<[1], [0], [0], [1], [0, 0, 1, 1], [], []>} : vector<1x128xf32>, vector<128x640xf32>, vector<1x640xf32> -> vector<1x640xf32>
    %166 = arith.index_cast %c5_i32 : i32 to index
    %c0_62 = arith.constant 0 : index
    %167 = vector.load %arg9[%166, %c0_62] : memref<8x640xf32, #tpu.memory_space<vmem>>, vector<1x640xf32>
    %168 = arith.mulf %165, %167 : vector<1x640xf32>
    %169 = vector.extract_strided_slice %168 {offsets = [0, 0], sizes = [1, 128], strides = [1, 1]} : vector<1x640xf32> to vector<1x128xf32>
    %170 = vector.extract_strided_slice %168 {offsets = [0, 128], sizes = [1, 128], strides = [1, 1]} : vector<1x640xf32> to vector<1x128xf32>
    %171 = arith.addf %169, %170 : vector<1x128xf32>
    %172 = vector.extract_strided_slice %168 {offsets = [0, 256], sizes = [1, 128], strides = [1, 1]} : vector<1x640xf32> to vector<1x128xf32>
    %173 = arith.addf %171, %172 : vector<1x128xf32>
    %174 = vector.extract_strided_slice %168 {offsets = [0, 384], sizes = [1, 128], strides = [1, 1]} : vector<1x640xf32> to vector<1x128xf32>
    %175 = arith.addf %173, %174 : vector<1x128xf32>
    %176 = vector.extract_strided_slice %168 {offsets = [0, 512], sizes = [1, 128], strides = [1, 1]} : vector<1x640xf32> to vector<1x128xf32>
    %177 = arith.addf %175, %176 : vector<1x128xf32>
    %178 = arith.addf %163, %177 : vector<1x128xf32>
    %c6_i32 = arith.constant 6 : i32
    %c0_63 = arith.constant 0 : index
    %c0_64 = arith.constant 0 : index
    %179 = vector.load %arg8[%c0_63, %c0_64] : memref<128x640xf32, #tpu.memory_space<vmem>>, vector<128x640xf32>
    %cst_65 = arith.constant dense<0.000000e+00> : vector<1x640xf32>
    %180 = tpu.matmul %178, %179, %cst_65 {dimension_numbers = #tpu.dot_dimension_numbers<[1], [0], [0], [1], [0, 0, 1, 1], [], []>} : vector<1x128xf32>, vector<128x640xf32>, vector<1x640xf32> -> vector<1x640xf32>
    %181 = arith.index_cast %c6_i32 : i32 to index
    %c0_66 = arith.constant 0 : index
    %182 = vector.load %arg9[%181, %c0_66] : memref<8x640xf32, #tpu.memory_space<vmem>>, vector<1x640xf32>
    %183 = arith.mulf %180, %182 : vector<1x640xf32>
    %184 = vector.extract_strided_slice %183 {offsets = [0, 0], sizes = [1, 128], strides = [1, 1]} : vector<1x640xf32> to vector<1x128xf32>
    %185 = vector.extract_strided_slice %183 {offsets = [0, 128], sizes = [1, 128], strides = [1, 1]} : vector<1x640xf32> to vector<1x128xf32>
    %186 = arith.addf %184, %185 : vector<1x128xf32>
    %187 = vector.extract_strided_slice %183 {offsets = [0, 256], sizes = [1, 128], strides = [1, 1]} : vector<1x640xf32> to vector<1x128xf32>
    %188 = arith.addf %186, %187 : vector<1x128xf32>
    %189 = vector.extract_strided_slice %183 {offsets = [0, 384], sizes = [1, 128], strides = [1, 1]} : vector<1x640xf32> to vector<1x128xf32>
    %190 = arith.addf %188, %189 : vector<1x128xf32>
    %191 = vector.extract_strided_slice %183 {offsets = [0, 512], sizes = [1, 128], strides = [1, 1]} : vector<1x640xf32> to vector<1x128xf32>
    %192 = arith.addf %190, %191 : vector<1x128xf32>
    %193 = arith.addf %178, %192 : vector<1x128xf32>
    %c7_i32 = arith.constant 7 : i32
    %c0_67 = arith.constant 0 : index
    %c0_68 = arith.constant 0 : index
    %194 = vector.load %arg7[%c0_67, %c0_68] : memref<1x128xf32, #tpu.memory_space<vmem>>, vector<1x128xf32>
    tpu.vector_store %arg7[%c0_67, %c0_68], %193 {strides = array<i32>} : memref<1x128xf32, #tpu.memory_space<vmem>>, vector<1x128xf32>,
    return
  }
}

</mosaic_0001>

<bundles_post_ra>
// kernel: tpu_custom_call.1
= control target key start
LH: loop header
LB: loop body
LE: loop exit
PB: predicated region body
PF: predicated region fallthrough
CT: control target
= control target key end

     0   :  { %12 = vsyncpa [#allocation5], 0  ;;  %s4418_s0 = inlined_call_operand.vmem [shape: f32[8,1], index: 0, kind: input, shape index: {}]   ;;  %s4419_s1 = inlined_call_operand.vmem [shape: f32[8,1], index: 1, kind: input, shape index: {}]   ;;  %s4420_s2 = inlined_call_operand.vmem [shape: f32[1,4], index: 2, kind: input, shape index: {}]   ;;  %s4421_s3 = inlined_call_operand.vmem [shape: f32[5,4], index: 3, kind: input, shape index: {}]   ;;  %s4422_s4 = inlined_call_operand.hbm [shape: f32[4,128,128], index: 4, kind: input, shape index: {}]   ;;  %s4423_s5 = inlined_call_operand.hbm [shape: f32[128,512], index: 5, kind: input, shape index: {}]   ;;  %s4424_s6 = inlined_call_operand.vmem [shape: f32[1,128], index: 6, kind: input, shape index: {}]   ;;  %s4425_s7 = inlined_call_operand.hbm [shape: f32[1,128], index: 7, kind: output, shape index: {}]  }
   0x1   :  { %13 = vsyncpa [#allocation8], 0 }
   0x2   :  { %14 = vsyncpa [#allocation6], 0  ;;  %s3645_s24 = smov [#allocation4]   ;;  %s3573_s28 = scalar_lea.hbm %s4422_s4, 8192 }
   0x3   :  { %s28_s25 = sshll.u32 %s3645_s24, 4  ;;  %p3574_p0 = scmp.ne.s32.totalorder %s4422_s4, %s3573_s28  ;;  %s29_s25 = int_to_ptr.vmem [resolvable:$true] %s28_s25 }
   0x4   :  { %p3577_p1 = scmp.lt.u32.totalorder %s3573_s28, %s4422_s4 }
   0x6   :  { %p3579_p2 = pnand %p3577_p1, %p3574_p0 }
   0x8   :  { %3582 = shalt.err (!%p3579_p2)
}
   0x9   :  { %s3583_s10 = scalar_lea.vmem %s29_s25, 8192  ;;  %p3588_p4 = scmp.lt.s32.totalorder %s29_s25, %s29_s25 }
   0xa   :  { %p3584_p3 = scmp.ne.s32.totalorder %s29_s25, %s3583_s10  ;;  %p3589_p5 = scmp.lt.s32.totalorder %s3583_s10, %s3583_s10 }
   0xc   :  { %p3590_p6 = por %p3589_p5, %p3588_p4 }
   0xe   :  { %p3591_p7 = pnand %p3590_p6, %p3584_p3 }
  0x10   :  { %3594 = shalt.err (!%p3591_p7)
}
  0x11   :  { %s3646_s11 = smov 128   ;;  %s3647_s12 = smov 8  }
  0x12   :  { %34 = dma.hbm_to_vmem [thread:$0]  %s4422_s4, 8192, %s29_s25, [#allocation5], %s3646_s11, %s3646_s11, %s3647_s12  }
  0x13   :  { %s3648_s15 = smov [#allocation7]   ;;  %s3595_s19 = scalar_lea.hbm %s4423_s5, 8192 }
  0x14   :  { %s40_s16 = sshll.u32 %s3648_s15, 4  ;;  %p3596_p8 = scmp.ne.s32.totalorder %s4423_s5, %s3595_s19  ;;  %s41_s16 = int_to_ptr.vmem [resolvable:$true] %s40_s16 }
  0x15   :  { %p3599_p9 = scmp.lt.u32.totalorder %s3595_s19, %s4423_s5 }
  0x17   :  { %p3601_p10 = pnand %p3599_p9, %p3596_p8 }
  0x19   :  { %3604 = shalt.err (!%p3601_p10)
}
  0x1a   :  { %s3605_s24 = scalar_lea.vmem %s41_s16, 8192  ;;  %p3610_p12 = scmp.lt.s32.totalorder %s41_s16, %s41_s16 }
  0x1b   :  { %p3606_p11 = scmp.ne.s32.totalorder %s41_s16, %s3605_s24  ;;  %p3611_p13 = scmp.lt.s32.totalorder %s3605_s24, %s3605_s24 }
  0x1d   :  { %p3612_p0 = por %p3611_p13, %p3610_p12 }
  0x1f   :  { %p3613_p1 = pnand %p3612_p0, %p3606_p11 }
  0x21   :  { %3616 = shalt.err (!%p3613_p1)
}
  0x22   :  { %s3649_s4 = smov 512   ;;  %s3650_s25 = smov 32  }
  0x23   :  { %46 = dma.hbm_to_vmem [thread:$0]  %s4423_s5, 8192, %s41_s16, [#allocation8], %s3649_s4, %s3649_s4, %s3650_s25  }
  0x24   :  { %3639 = dma.done.wait [#allocation5], 8192  }
  0x25   :  { %3640 = vsyncadd [#allocation5], 4294959104 }
  0x26   :  { %3641 = dma.done.wait [#allocation8], 8192  }
  0x27   :  { %3642 = vsyncadd [#allocation8], 4294959104  ;;  %v3651_v0 = vmov 0   ;;  %v3652_v1 = vmov 1   ;;  %v427_v2 = vld [vmem:[%s4418_s0] sm:$0xff]  ;;  %v81_v8 = vlaneseq  ;;  %v3653_v15 = vmov 2  }
  0x28   :  { %3555 = vset.pattern.permute.xlu0 %v3651_v0  ;;  %3556 = vset.pattern.permute.xlu1 %v3652_v1  ;;  %v55_v3 = vld [vmem:[%s4420_s2] sm:$0x1]  ;;  %v428_v4 = vmul.f32 6.2831855, %v427_v2  ;;  %v3654_v16 = vmov 3   ;;  %v296_v17 = vld [vmem:[#allocation7] sm:$0xff] }
  0x29   :  { %v2531_v5 = vmul.f32 -1.442695, %v55_v3  ;;  %v3738_v9 = vshrl.u32 %v81_v8, 7  ;;  %v300_v18 = vld [vmem:[#allocation7 + $0x20] sm:$0xff]  ;;  %v538_v20 = vld [vmem:[%s4421_s3] sm:$0x1f] }
  0x2a   :  { %431 = vperm.xlu0 %3555, %v428_v4   ;;  %v3744_v19 = vpack.c.bf16 %v300_v18, %v296_v17  ;;  %vm543_vm0 = vcmask 1044480   ;;  %v298_v21 = vld [vmem:[#allocation7 + $0x10] sm:$0xff]  ;;  %v4426_v22 = vmov 0.0   ;;  %vm3656_vm1 = vmmov 0   ;;  %s3664_s10 = smov 127   ;;  %s3665_s11 = smov 125  }
  0x2b   :  { %3561 = vpow2.f32 %v2531_v5  ;;  %v3741_v12 = vsub.s32 0, %v3738_v9  ;;  %2662 = vmatprep.subr.mxu0 %v4426_v22  ;;  %2664 = vmatprep.mubr.msk.f32.mxu0 %vm3656_vm1, %v4426_v22  ;;  %v302_v23 = vld [vmem:[#allocation7 + $0x30] sm:$0xff]  ;;  %v425_v25 = vand.u32 127, %v81_v8  ;;  %v3657_v39 = vmov 683565275   ;;  %s3666_s12 = smov 126  }
  0x2c   :  { %4445 = vst [vmem:[#allocation14_spill] sm:$0xff] %v3744_v19  ;;  %2913 = vmatprep.subr.bf16.mxu1 %v3744_v19  ;;  %2663 = vmatpush3.msk.msra.mxu0 %vm543_vm0, %v538_v20  ;;  %v3753_v24 = vpack.c.bf16 %v302_v23, %v298_v21  ;;  %v3658_v41 = vmov 2475754826   ;;  %v3659_v44 = vmov 2131351028   ;;  %v324_v23 = vld [vmem:[#allocation7 + $0xe0] sm:$0xff] }
  0x2d   :  { %4444 = vst [vmem:[#allocation13_spill] sm:$0xff] %v3741_v12  ;;  %815 = vmatprep.mubr.f32.mxu1 %v4426_v22  ;;  %v426_v26 = vcvt.s32.f32 %v425_v25  ;;  %v3660_v47 = vmov 2102212464   ;;  %v3661_v50 = vmov 920167782   ;;  %v328_v25 = vld [vmem:[#allocation7 + $0x100] sm:$0xff] }
  0x2e   :  { %2945 = vmatprep.subr.bf16.mxu0 %v3753_v24  ;;  %v3662_v53 = vmov 1326507024   ;;  %vm539_vm14 = vcmask 39936  }
  0x35   :  { %v3562_v6 = vpop.eup %3561 }
  0x36   :  { %v59_v7 = vadd.f32 1.0, %v3562_v6  ;;  %v304_v6 = vld [vmem:[#allocation7 + $0x40] sm:$0xff] }
  0x38   :  { %3563 = vrcp.f32 %v59_v7  ;;  %v308_v7 = vld [vmem:[#allocation7 + $0x60] sm:$0xff] }
  0x42   :  { %v3564_v10 = vpop.eup %3563 }
  0x43   :  { %v62_v11 = vmul.f32 2.0, %v3564_v10 }
  0x45   :  { %v2532_v13 = vadd.f32 -1.0, %v62_v11 }
  0x47   :  { %v84_v14 = vrot.slane %v2532_v13, %v3741_v12 }
  0x49   :  { %139 = vperm.xlu1 %3556, %v84_v14   ;;  %86 = vperm.xlu0 %3555, %v84_v14  }
  0x4d   :  { %3557 = vset.pattern.permute.xlu1 %v3653_v15  ;;  %3558 = vset.pattern.permute.xlu0 %v3654_v16  ;;  %v316_v15 = vld [vmem:[#allocation7 + $0xa0] sm:$0xff] }
  0x4e   :  { %192 = vperm.xlu1 %3557, %v84_v14   ;;  %245 = vperm.xlu0 %3558, %v84_v14   ;;  %v312_v14 = vld [vmem:[#allocation7 + $0x80] sm:$0xff] }
  0x4f   :  { %v320_v16 = vld [vmem:[#allocation7 + $0xc0] sm:$0xff] }
  0x52   :  { %3560 = vset.pattern.permute.xlu0 %v3651_v0  ;;  %3559 = vset.pattern.permute.xlu1 %v3651_v0 }
  0xa9   :  { %v432_v27 = vpop.permute.xlu0 %431 }
  0xaa   :  { %v3757_v28 = vmul.f32 %v432_v27, %v426_v26  ;;  %v332_v26 = vld [vmem:[#allocation7 + $0x120] sm:$0xff] }
  0xab   :  { %v336_v27 = vld [vmem:[#allocation7 + $0x140] sm:$0xff] }
  0xac   :  { %v438_v29 = vand.u32 2139095040, %v3757_v28  ;;  %v435_v33 = vand.u32 2147483647, %v3757_v28  ;;  %vm437_vm9 = vcmp.lt.s32.totalorder %v3757_v28, 0  ;;  %vm527_vm15 = vweird.f32 %v3757_v28 }
  0xae   :  { %v439_v30 = vshrl.u32 %v438_v29, 23  ;;  %v442_v36 = vand.u32 8388607, %v435_v33  ;;  %v340_v29 = vld [vmem:[#allocation7 + $0x160] sm:$0xff]  ;;  %vm3902_vm10 = vcmp.le.f32.partialorder %v435_v33, 0.7853982 }
  0xb0   :  { %v2533_v31 = vadd.s32 4294967169, %v439_v30  ;;  %v443_v55 = vor.u32 8388608, %v442_v36  ;;  %v344_v30 = vld [vmem:[#allocation7 + $0x180] sm:$0xff] }
  0xb1   :  { %v64_v36 = vld [vmem:[#allocation4] sm:$0xff] }
  0xb2   :  { %v445_v32 = vadd.s32 1, %v2533_v31  ;;  %v483_v5 = vshll.u32 %v443_v55, 8 }
  0xb4   :  { %vm446_vm2 = vcmp.gt.s32.totalorder %v445_v32, 0 }
  0xb5   :  { %v447_v34 = vsel %vm446_vm2, %v445_v32, 0  ;;  %v348_v32 = vld [vmem:[#allocation7 + $0x1a0] sm:$0xff] }
  0xb6   :  { %v449_v35 = vand.u32 31, %v447_v34  ;;  %v448_v38 = vshrl.u32 %v447_v34, 5  ;;  %v352_v34 = vld [vmem:[#allocation7 + $0x1c0] sm:$0xff]  ;;  %v3791_v55 = vpack.c.bf16 %v348_v32, %v344_v30  ;;  %v231_v30 = vld [vmem:[#allocation4 + $0x198] sm:$0xff] }
  0xb8   :  { %v450_v37 = vsub.s32 32, %v449_v35  ;;  %v452_v40 = vshll.u32 %v3657_v39, %v449_v35  ;;  %v455_v42 = vshll.u32 %v3658_v41, %v449_v35  ;;  %v458_v46 = vshll.u32 %v3659_v44, %v449_v35 }
  0xb9   :  { %v461_v49 = vshll.u32 %v3660_v47, %v449_v35  ;;  %v464_v52 = vshll.u32 %v3661_v50, %v449_v35  ;;  %vm467_vm3 = vcmp.lt.s32.totalorder %v448_v38, 1  ;;  %vm470_vm4 = vcmp.lt.s32.totalorder %v448_v38, 4  ;;  %v356_v35 = vld [vmem:[#allocation7 + $0x1e0] sm:$0xff] }
  0xba   :  { %v453_v43 = vshrl.u32 %v3658_v41, %v450_v37  ;;  %v456_v45 = vshrl.u32 %v3659_v44, %v450_v37  ;;  %v459_v48 = vshrl.u32 %v3660_v47, %v450_v37  ;;  %v462_v51 = vshrl.u32 %v3661_v50, %v450_v37  ;;  %v123_v44 = vld [vmem:[#allocation4 + $0x88] sm:$0xff] }
  0xbb   :  { %v465_v54 = vshrl.u32 %v3662_v53, %v450_v37  ;;  %v451_v0 = vshrl.u32 %v3657_v39, %v450_v37  ;;  %vm469_vm5 = vcmp.lt.s32.totalorder %v448_v38, 3  ;;  %vm468_vm6 = vcmp.lt.s32.totalorder %v448_v38, 2  ;;  %v65_v37 = vld [vmem:[#allocation4 + $0x8] sm:$0xff]  ;;  %v122_v39 = vld [vmem:[#allocation4 + $0x80] sm:$0xff]  ;;  %v67_v38 = vld [vmem:[#allocation4 + $0x18] sm:$0xff] }
  0xbc   :  { %v454_v56 = vor.u32 %v453_v43, %v452_v40  ;;  %v457_v57 = vor.u32 %v456_v45, %v455_v42  ;;  %v460_v58 = vor.u32 %v459_v48, %v458_v46  ;;  %v463_v59 = vor.u32 %v462_v51, %v461_v49  ;;  %v66_v45 = vld [vmem:[#allocation4 + $0x10] sm:$0xff]  ;;  %v125_v53 = vld [vmem:[#allocation4 + $0x98] sm:$0xff] }
  0xbd   :  { %v466_v60 = vor.u32 %v465_v54, %v464_v52  ;;  %v3772_v40 = vpack.c.bf16 %v308_v7, %v304_v6  ;;  %v3774_v41 = vpack.c.bf16 %v316_v15, %v312_v14  ;;  %v3776_v42 = vpack.c.bf16 %v324_v23, %v320_v16  ;;  %v124_v52 = vld [vmem:[#allocation4 + $0x90] sm:$0xff]  ;;  %v68_v54 = vld [vmem:[#allocation4 + $0x20] sm:$0xff]  ;;  %v176_v7 = vld [vmem:[#allocation4 + $0x108] sm:$0xff] }
  0xbe   :  { %v472_v61 = vsel %vm470_vm4, %v460_v58, 2102212464  ;;  %v475_v62 = vsel %vm467_vm3, %v454_v56, %v457_v57  ;;  %v479_v63 = vsel %vm467_vm3, %v457_v57, %v460_v58  ;;  %v476_v1 = vsel %vm470_vm4, %v463_v59, 920167782 }
  0xbf   :  { %v480_v2 = vsel %vm470_vm4, %v466_v60, 1326507024  ;;  %v477_v3 = vsel %vm469_vm5, %v460_v58, %v476_v1  ;;  %v471_v8 = vsel %vm467_vm3, %v451_v0, %v454_v56  ;;  %v473_v10 = vsel %vm469_vm5, %v457_v57, %v472_v61  ;;  %v69_v61 = vld [vmem:[#allocation4 + $0x28] sm:$0xff]  ;;  %v175_v1 = vld [vmem:[#allocation4 + $0x100] sm:$0xff] }
  0xc0   :  { %v481_v4 = vsel %vm469_vm5, %v463_v59, %v480_v2  ;;  %v478_v11 = vsel %vm468_vm6, %v475_v62, %v477_v3  ;;  %v474_v31 = vsel %vm468_vm6, %v471_v8, %v473_v10  ;;  %v3780_v46 = vpack.c.bf16 %v332_v26, %v328_v25  ;;  %v126_v62 = vld [vmem:[#allocation4 + $0xa0] sm:$0xff] }
  0xc1   :  { %v482_v13 = vsel %vm468_vm6, %v479_v63, %v481_v4  ;;  %v3768_v20 = vmul.u32.u64.low %v483_v5, %v478_v11  ;;  %v3769_v21 = vmul.u32.u64.high %v483_v5, %v478_v11, %v3768_v20  ;;  %v3782_v47 = vpack.c.bf16 %v340_v29, %v336_v27  ;;  %v127_v4 = vld [vmem:[#allocation4 + $0xa8] sm:$0xff]  ;;  %v228_v8 = vld [vmem:[#allocation4 + $0x180] sm:$0xff] }
  0xc2   :  { %v3765_v17 = vmul.u32.u64.low %v483_v5, %v482_v13  ;;  %v3766_v18 = vmul.u32.u64.high %v483_v5, %v482_v13, %v3765_v17  ;;  %v490_v48 = vmul.u32 %v483_v5, %v474_v31  ;;  %v3793_v56 = vpack.c.bf16 %v356_v35, %v352_v34  ;;  %v70_v5 = vld [vmem:[#allocation4 + $0x30] sm:$0xff] }
  0xc3   :  { %v493_v43 = vadd.s32 1, %v3769_v21  ;;  %v177_v13 = vld [vmem:[#allocation4 + $0x110] sm:$0xff]  ;;  %v229_v17 = vld [vmem:[#allocation4 + $0x188] sm:$0xff] }
  0xc4   :  { %vm492_vm7 = vc.u32 %v3766_v18, %v3768_v20  ;;  %v3785_v49 = vadd.s32 %v3768_v20, %v3766_v18  ;;  %v178_v18 = vld [vmem:[#allocation4 + $0x118] sm:$0xff]  ;;  %v230_v20 = vld [vmem:[#allocation4 + $0x190] sm:$0xff] }
  0xc5   :  { %v494_v57 = vsel %vm492_vm7, %v493_v43, %v3769_v21 }
  0xc6   :  { %v495_v63 = vadd.s32 %v494_v57, %v490_v48  ;;  %v180_v57 = vld [vmem:[#allocation4 + $0x128] sm:$0xff] }
  0xc8   :  { %v3787_v50 = vpop.permute.xlu1 %139  ;;  %v3789_v51 = vpop.permute.xlu0 %86  ;;  %v496_v15 = vadd.s32 536870912, %v495_v63 }
  0xc9   :  { %v89_v58 = vmul.f32 %v3789_v51, %v64_v36  ;;  %v90_v59 = vmul.f32 %v3789_v51, %v65_v37  ;;  %v142_v60 = vmul.f32 %v3787_v50, %v122_v39  ;;  %v143_v0 = vmul.f32 %v3787_v50, %v123_v44 }
  0xca   :  { %v91_v2 = vmul.f32 %v3789_v51, %v66_v45  ;;  %v92_v3 = vmul.f32 %v3789_v51, %v67_v38  ;;  %v144_v10 = vmul.f32 %v3787_v50, %v124_v52  ;;  %v145_v11 = vmul.f32 %v3787_v50, %v125_v53  ;;  %v179_v38 = vld [vmem:[#allocation4 + $0x120] sm:$0xff] }
  0xcb   :  { %v158_v6 = vadd.f32 %v142_v60, %v89_v58  ;;  %v93_v14 = vmul.f32 %v3789_v51, %v68_v54  ;;  %v159_v16 = vadd.f32 %v143_v0, %v90_v59  ;;  %v94_v21 = vmul.f32 %v3789_v51, %v69_v61  ;;  %v232_v58 = vld [vmem:[#allocation4 + $0x1a0] sm:$0xff]  ;;  %v233_v0 = vld [vmem:[#allocation4 + $0x1a8] sm:$0xff] }
  0xcc   :  { %v146_v23 = vmul.f32 %v3787_v50, %v126_v62  ;;  %v160_v27 = vadd.f32 %v144_v10, %v91_v2  ;;  %v161_v29 = vadd.f32 %v145_v11, %v92_v3  ;;  %v147_v31 = vmul.f32 %v3787_v50, %v127_v4 }
  0xcd   :  { %v3809_v25 = vpop.permute.xlu1 %192  ;;  %v3811_v26 = vpop.permute.xlu0 %245  ;;  %v95_v32 = vmul.f32 %v3789_v51, %v70_v5  ;;  %v3815_v34 = vshrl.u32 %v496_v15, 30  ;;  %v71_v5 = vld [vmem:[#allocation4 + $0x38] sm:$0xff]  ;;  %v181_v15 = vld [vmem:[#allocation4 + $0x130] sm:$0xff] }
  0xce   :  { %v195_v35 = vmul.f32 %v3809_v25, %v175_v1  ;;  %v196_v36 = vmul.f32 %v3809_v25, %v176_v7  ;;  %v248_v37 = vmul.f32 %v3811_v26, %v228_v8  ;;  %v249_v39 = vmul.f32 %v3811_v26, %v229_v17  ;;  %v128_v7 = vld [vmem:[#allocation4 + $0xb0] sm:$0xff] }
  0xcf   :  { %v197_v43 = vmul.f32 %v3809_v25, %v177_v13  ;;  %v198_v44 = vmul.f32 %v3809_v25, %v178_v18  ;;  %v250_v45 = vmul.f32 %v3811_v26, %v230_v20  ;;  %v498_v48 = vshll.u32 %v3815_v34, 30  ;;  %v129_v13 = vld [vmem:[#allocation4 + $0xb8] sm:$0xff]  ;;  %v234_v20 = vld [vmem:[#allocation4 + $0x1b0] sm:$0xff] }
  0xd0   :  { %v211_v52 = vadd.f32 %v195_v35, %v158_v6  ;;  %v212_v53 = vadd.f32 %v196_v36, %v159_v16  ;;  %v251_v54 = vmul.f32 %v3811_v26, %v231_v30  ;;  %v162_v61 = vadd.f32 %v146_v23, %v93_v14  ;;  %v182_v18 = vld [vmem:[#allocation4 + $0x138] sm:$0xff] }
  0xd1   :  { %v213_v59 = vadd.f32 %v197_v43, %v160_v27  ;;  %v214_v60 = vadd.f32 %v198_v44, %v161_v29  ;;  %v163_v62 = vadd.f32 %v147_v31, %v94_v21  ;;  %v3826_v1 = vsub.s32 %v495_v63, %v498_v48  ;;  %v235_v30 = vld [vmem:[#allocation4 + $0x1b8] sm:$0xff]  ;;  %v72_v31 = vld [vmem:[#allocation4 + $0x40] sm:$0xff]  ;;  %v73_v43 = vld [vmem:[#allocation4 + $0x48] sm:$0xff] }
  0xd2   :  { %v264_v2 = vadd.f32 %v248_v37, %v211_v52  ;;  %v265_v3 = vadd.f32 %v249_v39, %v212_v53  ;;  %v199_v4 = vmul.f32 %v3809_v25, %v179_v38  ;;  %v200_v10 = vmul.f32 %v3809_v25, %v180_v57  ;;  %v130_v44 = vld [vmem:[#allocation4 + $0xc0] sm:$0xff]  ;;  %v131_v53 = vld [vmem:[#allocation4 + $0xc8] sm:$0xff] }
  0xd3   :  { %v266_v8 = vadd.f32 %v250_v45, %v213_v59  ;;  %v267_v6 = vadd.f32 %v251_v54, %v214_v60  ;;  %v252_v11 = vmul.f32 %v3811_v26, %v232_v58  ;;  %v501_v14 = vsub.s32 0, %v3826_v1  ;;  %v183_v54 = vld [vmem:[#allocation4 + $0x140] sm:$0xff] }
  0xd4   :  { %v3832_v16 = vpack.c.bf16 %v265_v3, %v264_v2  ;;  %v215_v63 = vadd.f32 %v199_v4, %v162_v61  ;;  %v253_v17 = vmul.f32 %v3811_v26, %v233_v0  ;;  %v216_v23 = vadd.f32 %v200_v10, %v163_v62  ;;  %v184_v61 = vld [vmem:[#allocation4 + $0x148] sm:$0xff]  ;;  %v236_v62 = vld [vmem:[#allocation4 + $0x1c0] sm:$0xff]  ;;  %v74_v10 = vld [vmem:[#allocation4 + $0x50] sm:$0xff] }
  0xd5   :  { %v3835_v21 = vpack.c.bf16 %v267_v6, %v266_v8  ;;  %v96_v27 = vmul.f32 %v3789_v51, %v71_v5  ;;  %v148_v29 = vmul.f32 %v3787_v50, %v128_v7  ;;  %v2534_v35 = vmin.u32 %v501_v14, %v3826_v1  ;;  %v237_v4 = vld [vmem:[#allocation4 + $0x1c8] sm:$0xff] }
  0xd6   :  { %2915 = vmatpush1.bf16.msra.mxu1 %v3832_v16  ;;  %v268_v36 = vadd.f32 %v252_v11, %v215_v63  ;;  %v149_v37 = vmul.f32 %v3787_v50, %v129_v13  ;;  %v201_v39 = vmul.f32 %v3809_v25, %v181_v15  ;;  %v269_v45 = vadd.f32 %v253_v17, %v216_v23  ;;  %v75_v11 = vld [vmem:[#allocation4 + $0x58] sm:$0xff]  ;;  %v132_v23 = vld [vmem:[#allocation4 + $0xd0] sm:$0xff] }
  0xd7   :  { %2917 = vmatprep.subr.bf16.mxu1 %v3772_v40  ;;  %v164_v38 = vadd.f32 %v148_v29, %v95_v32  ;;  %v202_v48 = vmul.f32 %v3809_v25, %v182_v18  ;;  %v254_v52 = vmul.f32 %v3811_v26, %v234_v20  ;;  %v503_v57 = vclz %v2534_v35 }
  0xd8   :  { %v165_v58 = vadd.f32 %v149_v37, %v96_v27  ;;  %v255_v59 = vmul.f32 %v3811_v26, %v235_v30  ;;  %v97_v60 = vmul.f32 %v3789_v51, %v72_v31  ;;  %v3848_v0 = vpack.c.bf16 %v269_v45, %v268_v36  ;;  %v133_v27 = vld [vmem:[#allocation4 + $0xd8] sm:$0xff]  ;;  %v185_v36 = vld [vmem:[#allocation4 + $0x150] sm:$0xff] }
  0xd9   :  { %v217_v2 = vadd.f32 %v201_v39, %v164_v38  ;;  %v98_v3 = vmul.f32 %v3789_v51, %v73_v43  ;;  %v150_v32 = vmul.f32 %v3787_v50, %v130_v44  ;;  %v2535_v5 = vadd.s32 4294967294, %v503_v57  ;;  %v186_v37 = vld [vmem:[#allocation4 + $0x158] sm:$0xff]  ;;  %v238_v38 = vld [vmem:[#allocation4 + $0x1d0] sm:$0xff] }
  0xda   :  { %2919 = vmatpush1.bf16.msra.mxu1 %v3835_v21  ;;  %v218_v7 = vadd.f32 %v202_v48, %v165_v58  ;;  %v151_v8 = vmul.f32 %v3787_v50, %v131_v53  ;;  %v203_v6 = vmul.f32 %v3809_v25, %v183_v54  ;;  %v204_v14 = vmul.f32 %v3809_v25, %v184_v61  ;;  %v239_v57 = vld [vmem:[#allocation4 + $0x1d8] sm:$0xff]  ;;  %v76_v58 = vld [vmem:[#allocation4 + $0x60] sm:$0xff] }
  0xdb   :  { %2921 = vmatprep.subr.bf16.mxu1 %v3774_v41  ;;  %v270_v13 = vadd.f32 %v254_v52, %v217_v2  ;;  %v166_v15 = vadd.f32 %v150_v32, %v97_v60  ;;  %v256_v63 = vmul.f32 %v3811_v26, %v236_v62  ;;  %vm2536_vm8 = vcmp.lt.s32.totalorder %v2535_v5, 0  ;;  %v77_v62 = vld [vmem:[#allocation4 + $0x68] sm:$0xff] }
  0xdc   :  { %v271_v17 = vadd.f32 %v255_v59, %v218_v7  ;;  %v167_v18 = vadd.f32 %v151_v8, %v98_v3  ;;  %v257_v20 = vmul.f32 %v3811_v26, %v237_v4  ;;  %v506_v29 = vsel %vm2536_vm8, 0, %v2535_v5  ;;  %v134_v5 = vld [vmem:[#allocation4 + $0xe0] sm:$0xff]  ;;  %v135_v7 = vld [vmem:[#allocation4 + $0xe8] sm:$0xff] }
  0xdd   :  { %v219_v30 = vadd.f32 %v203_v6, %v166_v15  ;;  %v99_v31 = vmul.f32 %v3789_v51, %v74_v10  ;;  %v100_v35 = vmul.f32 %v3789_v51, %v75_v11  ;;  %v507_v39 = vsub.s32 32, %v506_v29  ;;  %v187_v11 = vld [vmem:[#allocation4 + $0x160] sm:$0xff] }
  0xde   :  { %v508_v43 = vshll.u32 %v3826_v1, %v506_v29  ;;  %v511_v44 = vsub.s32 4294967266, %v506_v29  ;;  %2923 = vmatpush1.bf16.msra.mxu1 %v3848_v0  ;;  %v3863_v45 = vpack.c.bf16 %v271_v17, %v270_v13  ;;  %v220_v48 = vadd.f32 %v204_v14, %v167_v18  ;;  %v188_v13 = vld [vmem:[#allocation4 + $0x168] sm:$0xff]  ;;  %v240_v18 = vld [vmem:[#allocation4 + $0x1e0] sm:$0xff] }
  0xdf   :  { %2925 = vmatprep.subr.bf16.mxu1 %v3776_v42  ;;  %v272_v52 = vadd.f32 %v256_v63, %v219_v30  ;;  %v152_v53 = vmul.f32 %v3787_v50, %v132_v23  ;;  %v153_v54 = vmul.f32 %v3787_v50, %v133_v27  ;;  %v509_v59 = vshrl.u32 %v3785_v49, %v507_v39  ;;  %v241_v30 = vld [vmem:[#allocation4 + $0x1e8] sm:$0xff] }
  0xe0   :  { %v512_v60 = vadd.s32 127, %v511_v44  ;;  %v205_v1 = vmul.f32 %v3809_v25, %v185_v36  ;;  %v206_v61 = vmul.f32 %v3809_v25, %v186_v37  ;;  %v273_v2 = vadd.f32 %v257_v20, %v220_v48  ;;  %v136_v44 = vld [vmem:[#allocation4 + $0xf0] sm:$0xff] }
  0xe1   :  { %v168_v3 = vadd.f32 %v152_v53, %v99_v31  ;;  %v169_v32 = vadd.f32 %v153_v54, %v100_v35  ;;  %v258_v4 = vmul.f32 %v3811_v26, %v238_v38  ;;  %v510_v8 = vor.u32 %v509_v59, %v508_v43  ;;  %v78_v31 = vld [vmem:[#allocation4 + $0x70] sm:$0xff]  ;;  %v79_v35 = vld [vmem:[#allocation4 + $0x78] sm:$0xff] }
  0xe2   :  { %v513_v6 = vshll.u32 %v512_v60, 23  ;;  %2927 = vmatpush1.bf16.msra.mxu1 %v3863_v45  ;;  %v259_v10 = vmul.f32 %v3811_v26, %v239_v57  ;;  %v101_v49 = vmul.f32 %v3789_v51, %v76_v58  ;;  %v3876_v15 = vpack.c.bf16 %v273_v2, %v272_v52  ;;  %v137_v38 = vld [vmem:[#allocation4 + $0xf8] sm:$0xff]  ;;  %v189_v57 = vld [vmem:[#allocation4 + $0x170] sm:$0xff] }
  0xe3   :  { %2929 = vmatprep.subr.bf16.mxu1 %v3780_v46  ;;  %v221_v14 = vadd.f32 %v205_v1, %v168_v3  ;;  %v222_v63 = vadd.f32 %v206_v61, %v169_v32  ;;  %v102_v17 = vmul.f32 %v3789_v51, %v77_v62  ;;  %v517_v23 = vcvt.s32.f32 %v510_v8  ;;  %v190_v58 = vld [vmem:[#allocation4 + $0x178] sm:$0xff]  ;;  %v242_v59 = vld [vmem:[#allocation4 + $0x1f0] sm:$0xff] }
  0xe4   :  { %v514_v20 = vor.u32 4788187, %v513_v6  ;;  %v154_v27 = vmul.f32 %v3787_v50, %v134_v5  ;;  %v155_v29 = vmul.f32 %v3787_v50, %v135_v7  ;;  %v207_v39 = vmul.f32 %v3809_v25, %v187_v11  ;;  %v243_v5 = vld [vmem:[#allocation4 + $0x1f8] sm:$0xff] }
  0xe5   :  { %v274_v36 = vadd.f32 %v258_v4, %v221_v14  ;;  %v275_v37 = vadd.f32 %v259_v10, %v222_v63  ;;  %v208_v43 = vmul.f32 %v3809_v25, %v188_v13  ;;  %v260_v54 = vmul.f32 %v3811_v26, %v240_v18 }
  0xe6   :  { %v515_v48 = vand.u32 2147483647, %v514_v20  ;;  %2931 = vmatpush1.bf16.msra.mxu1 %v3876_v15  ;;  %v170_v52 = vadd.f32 %v154_v27, %v101_v49  ;;  %v171_v53 = vadd.f32 %v155_v29, %v102_v17  ;;  %v261_v1 = vmul.f32 %v3811_v26, %v241_v30 }
  0xe7   :  { %2933 = vmatprep.subr.bf16.mxu1 %v3782_v47  ;;  %v3886_v60 = vpack.c.bf16 %v275_v37, %v274_v36  ;;  %v103_v61 = vmul.f32 %v3789_v51, %v78_v31  ;;  %v104_v62 = vmul.f32 %v3789_v51, %v79_v35  ;;  %v156_v4 = vmul.f32 %v3787_v50, %v136_v44  ;;  %v3927_v35 = vld [vmem:[%s4424_s6] sm:$0x1]  ;;  %v301_v44 = vld [vmem:[#allocation7 + $0x28] sm:$0xff] }
  0xe8   :  { %v518_v2 = vmul.f32 %v517_v23, %v515_v48  ;;  %v223_v3 = vadd.f32 %v207_v39, %v170_v52  ;;  %v224_v32 = vadd.f32 %v208_v43, %v171_v53  ;;  %v157_v7 = vmul.f32 %v3787_v50, %v137_v38  ;;  %v297_v43 = vld [vmem:[#allocation7 + $0x8] sm:$0xff]  ;;  %v306_v48 = vld [vmem:[#allocation7 + $0x50] sm:$0xff] }
  0xe9   :  { %v209_v8 = vmul.f32 %v3809_v25, %v189_v57  ;;  %v210_v6 = vmul.f32 %v3809_v25, %v190_v58  ;;  %v262_v10 = vmul.f32 %v3811_v26, %v242_v59  ;;  %v172_v51 = vadd.f32 %v156_v4, %v103_v61  ;;  %v310_v52 = vld [vmem:[#allocation7 + $0x70] sm:$0xff]  ;;  %v309_v61 = vld [vmem:[#allocation7 + $0x68] sm:$0xff] }
  0xea   :  { %v519_v49 = vxor.u32 2147483648, %v518_v2  ;;  %2935 = vmatpush1.bf16.msra.mxu1 %v3886_v60  ;;  %v276_v11 = vadd.f32 %v260_v54, %v223_v3  ;;  %v277_v13 = vadd.f32 %v261_v1, %v224_v32  ;;  %v173_v14 = vadd.f32 %v157_v7, %v104_v62  ;;  %v305_v1 = vld [vmem:[#allocation7 + $0x48] sm:$0xff]  ;;  %v318_v3 = vld [vmem:[#allocation7 + $0xb0] sm:$0xff] }
  0xeb   :  { %2937 = vmatprep.subr.bf16.mxu1 %v3791_v55  ;;  %v263_v63 = vmul.f32 %v3811_v26, %v243_v5  ;;  %v225_v18 = vadd.f32 %v209_v8, %v172_v51  ;;  %v521_v20 = vsub.s32 4, %v3815_v34  ;;  %v3932_v57 = vpack.c.bf16 %v301_v44, %v297_v43  ;;  %v317_v5 = vld [vmem:[#allocation7 + $0xa8] sm:$0xff]  ;;  %v322_v7 = vld [vmem:[#allocation7 + $0xd0] sm:$0xff] }
  0xec   :  { %v520_v25 = vsel %vm437_vm9, %v519_v49, %v518_v2  ;;  %v3908_v17 = vpack.c.bf16 %v277_v13, %v276_v11  ;;  %v226_v23 = vadd.f32 %v210_v6, %v173_v14  ;;  %v3935_v59 = vpack.c.bf16 %v310_v52, %v306_v48  ;;  %v314_v2 = vld [vmem:[#allocation7 + $0x90] sm:$0xff]  ;;  %v321_v49 = vld [vmem:[#allocation7 + $0xc8] sm:$0xff] }
  0xed   :  { %v523_v27 = vsel %vm3902_vm10, %v3757_v28, %v520_v25  ;;  %v278_v26 = vadd.f32 %v262_v10, %v225_v18  ;;  %v522_v29 = vsel %vm437_vm9, %v521_v20, %v3815_v34  ;;  %v3938_v32 = vpack.c.bf16 %v309_v61, %v305_v1  ;;  %v313_v28 = vld [vmem:[#allocation7 + $0x88] sm:$0xff]  ;;  %v326_v8 = vld [vmem:[#allocation7 + $0xf0] sm:$0xff]  ;;  %v303_v1 = vld [vmem:[#allocation7 + $0x38] sm:$0xff] }
  0xee   :  { %2939 = vmatpush1.bf16.msra.mxu1 %v3908_v17  ;;  %3565 = vcosq.f32 %v523_v27  ;;  %v279_v33 = vadd.f32 %v263_v63, %v226_v23  ;;  %v524_v31 = vsel %vm3902_vm10, 0, %v522_v29  ;;  %v3942_v4 = vpack.c.bf16 %v318_v3, %v314_v2  ;;  %v325_v11 = vld [vmem:[#allocation7 + $0xe8] sm:$0xff]  ;;  %v330_v13 = vld [vmem:[#allocation7 + $0x110] sm:$0xff]  ;;  %v307_v2 = vld [vmem:[#allocation7 + $0x58] sm:$0xff] }
  0xef   :  { %2941 = vmatprep.subr.bf16.mxu1 %v3793_v56  ;;  %3567 = vsinq.f32 %v523_v27  ;;  %v528_v36 = vand.u32 3, %v524_v31  ;;  %v3945_v6 = vpack.c.bf16 %v317_v5, %v313_v28  ;;  %v3948_v10 = vpack.c.bf16 %v326_v8, %v322_v7  ;;  %v334_v51 = vld [vmem:[#allocation7 + $0x130] sm:$0xff]  ;;  %v329_v50 = vld [vmem:[#allocation7 + $0x108] sm:$0xff]  ;;  %v311_v3 = vld [vmem:[#allocation7 + $0x78] sm:$0xff] }
  0xf0   :  { %v3919_v30 = vpack.c.bf16 %v279_v33, %v278_v26  ;;  %v3951_v14 = vpack.c.bf16 %v325_v11, %v321_v49  ;;  %v3954_v63 = vpack.c.bf16 %v334_v51, %v330_v13  ;;  %v333_v25 = vld [vmem:[#allocation7 + $0x128] sm:$0xff]  ;;  %v338_v18 = vld [vmem:[#allocation7 + $0x150] sm:$0xff]  ;;  %v4428_v61 = vmov 0.0|0.0   ;;  %v315_v5 = vld [vmem:[#allocation7 + $0x98] sm:$0xff] }
  0xf1   :  { %vm533_vm11 = vcmp.eq.s32.totalorder %v528_v36, 2  ;;  %vm530_vm12 = vcmp.eq.s32.totalorder %v528_v36, 0  ;;  %vm529_vm13 = vcmp.lt.s32.totalorder %v528_v36, 2  ;;  %v342_v20 = vld [vmem:[#allocation7 + $0x170] sm:$0xff]  ;;  %v3957_v23 = vpack.c.bf16 %v333_v25, %v329_v50  ;;  %v337_v26 = vld [vmem:[#allocation7 + $0x148] sm:$0xff]  ;;  %v319_v7 = vld [vmem:[#allocation7 + $0xb8] sm:$0xff] }
  0xf2   :  { %2943 = vmatpush1.bf16.msra.mxu1 %v3919_v30  ;;  %v3960_v27 = vpack.c.bf16 %v342_v20, %v338_v18  ;;  %v341_v33 = vld [vmem:[#allocation7 + $0x168] sm:$0xff]  ;;  %v346_v29 = vld [vmem:[#allocation7 + $0x190] sm:$0xff]  ;;  %v4002_v28 = vpack.c.bf16 %v311_v3, %v307_v2  ;;  %v4006_v8 = vpack.c.bf16 %v319_v7, %v315_v5  ;;  %v323_v49 = vld [vmem:[#allocation7 + $0xd8] sm:$0xff] }
  0xf3   :  { %v350_v31 = vld [vmem:[#allocation7 + $0x1b0] sm:$0xff]  ;;  %v3963_v36 = vpack.c.bf16 %v341_v33, %v337_v26  ;;  %v353_v52 = vld [vmem:[#allocation7 + $0x1c8] sm:$0xff]  ;;  %2976 = vmatprep.subr.bf16.mxu1 %v4428_v61  ;;  %v327_v11 = vld [vmem:[#allocation7 + $0xf8] sm:$0xff] }
  0xf4   :  { %v354_v43 = vld [vmem:[#allocation7 + $0x1d0] sm:$0xff]  ;;  %v4010_v13 = vpack.c.bf16 %v327_v11, %v323_v49  ;;  %v331_v51 = vld [vmem:[#allocation7 + $0x118] sm:$0xff] }
  0xf5   :  { %816 = vmatmul.mubr.f32.vlgmr.msra.gmra.mrb[0].mxu1 %v3927_v35  ;;  %v358_v44 = vld [vmem:[#allocation7 + $0x1f0] sm:$0xff]  ;;  %v335_v50 = vld [vmem:[#allocation7 + $0x138] sm:$0xff] }
  0xf6   :  { %2699 = vmatprep.mubr.msk.f32.mxu1 %vm3656_vm1, %v4426_v22  ;;  %v3972_v48 = vpack.c.bf16 %v358_v44, %v354_v43  ;;  %v4014_v25 = vpack.c.bf16 %v335_v50, %v331_v51  ;;  %v339_v18 = vld [vmem:[#allocation7 + $0x158] sm:$0xff]  ;;  %v625_v7 = vld [vmem:[%s4419_s1] sm:$0xff]  ;;  %s3667_s1 = smov [#allocation9]  }
  0xf7   :  { %v343_v20 = vld [vmem:[#allocation7 + $0x178] sm:$0xff]  ;;  %s2521_s13 = sshll.u32 %s3667_s1, 4  ;;  %s2522_s13 = int_to_ptr.vmem [resolvable:$true] %s2521_s13 }
  0xf8   :  { %v3566_v37 = vpop.eup %3565  ;;  %4449 = vst [vmem:[#allocation16_spill] sm:$0xff] %v3972_v48  ;;  %v4018_v26 = vpack.c.bf16 %v343_v20, %v339_v18  ;;  %v347_v33 = vld [vmem:[#allocation7 + $0x198] sm:$0xff]  ;;  %s3617_s14 = scalar_lea.vmem %s2522_s13, 16  ;;  %s3621_s15 = scalar_lea.vmem %s2522_s13, 32 }
  0xf9   :  { %v3568_v34 = vpop.eup %3567  ;;  %v534_v39 = vxor.u32 2147483648, %v3566_v37  ;;  %p3618_p2 = scmp.ne.s32.totalorder %s2522_s13, %s3617_s14  ;;  %p3622_p3 = scmp.lt.s32.totalorder %s2522_s13, %s2522_s13 }
  0xfa   :  { %v531_v38 = vxor.u32 2147483648, %v3568_v34  ;;  %p3623_p4 = scmp.lt.s32.totalorder %s3621_s15, %s3617_s14 }
  0xfb   :  { %v535_v53 = vsel %vm533_vm11, %v534_v39, %v3568_v34  ;;  %v345_v34 = vld [vmem:[#allocation7 + $0x188] sm:$0xff] }
  0xfc   :  { %v532_v54 = vsel %vm530_vm12, %v3566_v37, %v531_v38  ;;  %v3966_v37 = vpack.c.bf16 %v350_v31, %v346_v29  ;;  %v349_v39 = vld [vmem:[#allocation7 + $0x1a8] sm:$0xff]  ;;  %v351_v29 = vld [vmem:[#allocation7 + $0x1b8] sm:$0xff]  ;;  %p3624_p5 = por %p3623_p4, %p3622_p3 }
  0xfd   :  { %v536_v58 = vsel %vm529_vm13, %v532_v54, %v535_v53  ;;  %v3969_v38 = vpack.c.bf16 %v349_v39, %v345_v34  ;;  %v357_v53 = vld [vmem:[#allocation7 + $0x1e8] sm:$0xff]  ;;  %v4022_v31 = vpack.c.bf16 %v351_v29, %v347_v33  ;;  %v355_v34 = vld [vmem:[#allocation7 + $0x1d8] sm:$0xff] }
  0xfe   :  { %v537_v62 = vsel %vm527_vm15, nan, %v536_v58  ;;  %v3975_v54 = vpack.c.bf16 %v357_v53, %v353_v52  ;;  %v299_v58 = vld [vmem:[#allocation7 + $0x18] sm:$0xff]  ;;  %p3625_p6 = pnand %p3624_p5, %p3618_p2 }
  0xff   :  { %2665 = vmatmul.mubr.msk.f32.vlgmr.msra.gmra.mrb[0].mxu0 %vm539_vm14, %v537_v62  ;;  %4448 = vst [vmem:[#allocation15_spill] sm:$0xff] %v3969_v38  ;;  %v3998_v62 = vpack.c.bf16 %v303_v1, %v299_v58  ;;  %v359_v39 = vld [vmem:[#allocation7 + $0x1f8] sm:$0xff] }
 0x100   :  { %2947 = vmatpush1.bf16.msra.mxu0 %v3932_v57  ;;  %886 = vmatprep.mubr.f32.mxu0 %v4426_v22  ;;  %4450 = vst [vmem:[#allocation17_spill] sm:$0xff] %v3975_v54  ;;  %v4026_v43 = vpack.c.bf16 %v359_v39, %v355_v34 }
 0x101   :  { %2949 = vmatprep.subr.bf16.mxu0 %v3935_v59  ;;  %2978 = vmatpush3.bf16.msra.mxu1 %v3998_v62 }
 0x102   :  { %2979 = vmatprep.subr.bf16.mxu1 %v4428_v61 }
 0x104   :  { %2951 = vmatpush1.bf16.msra.mxu0 %v3938_v32 }
 0x105   :  { %2953 = vmatprep.subr.bf16.mxu0 %v3942_v4  ;;  %2981 = vmatpush3.bf16.msra.mxu1 %v4002_v28 }
 0x106   :  { %2982 = vmatprep.subr.bf16.mxu1 %v4428_v61 }
 0x108   :  { %2955 = vmatpush1.bf16.msra.mxu0 %v3945_v6 }
 0x109   :  { %2957 = vmatprep.subr.bf16.mxu0 %v3948_v10  ;;  %2984 = vmatpush3.bf16.msra.mxu1 %v4006_v8 }
 0x10a   :  { %2985 = vmatprep.subr.bf16.mxu1 %v4428_v61 }
 0x10c   :  { %2959 = vmatpush1.bf16.msra.mxu0 %v3951_v14 }
 0x10d   :  { %2961 = vmatprep.subr.bf16.mxu0 %v3954_v63  ;;  %2987 = vmatpush3.bf16.msra.mxu1 %v4010_v13 }
 0x10e   :  { %2988 = vmatprep.subr.bf16.mxu1 %v4428_v61 }
 0x110   :  { %2963 = vmatpush1.bf16.msra.mxu0 %v3957_v23 }
 0x111   :  { %2965 = vmatprep.subr.bf16.mxu0 %v3960_v27  ;;  %2990 = vmatpush3.bf16.msra.mxu1 %v4014_v25 }
 0x112   :  { %2991 = vmatprep.subr.bf16.mxu1 %v4428_v61 }
 0x114   :  { %2967 = vmatpush1.bf16.msra.mxu0 %v3963_v36 }
 0x115   :  { %2969 = vmatprep.subr.bf16.mxu0 %v3966_v37  ;;  %2993 = vmatpush3.bf16.msra.mxu1 %v4018_v26 }
 0x116   :  { %2994 = vmatprep.subr.bf16.mxu1 %v4428_v61 }
 0x118   :  { %2971 = vmatpush1.bf16.msra.mxu0 %v3969_v38 }
 0x119   :  { %2973 = vmatprep.subr.bf16.mxu0 %v3972_v48  ;;  %2996 = vmatpush3.bf16.msra.mxu1 %v4022_v31 }
 0x11a   :  { %2997 = vmatprep.subr.bf16.mxu1 %v4428_v61 }
 0x11c   :  { %2975 = vmatpush1.bf16.msra.mxu0 %v3975_v54 }
 0x11d   :  { %3001 = vmatprep.subr.bf16.mxu0 %v3744_v19  ;;  %2999 = vmatpush3.bf16.msra.mxu1 %v4026_v43 }
 0x11e   :  { %3033 = vmatprep.subr.bf16.mxu1 %v3753_v24 }
 0x11f   :  { %887 = vmatmul.mubr.f32.vlgmr.msra.gmra.mrb[2].mxu0 %v3927_v35 }
 0x120   :  { %3003 = vmatpush1.bf16.msra.mxu0 %v3832_v16  ;;  %1066 = vmatprep.mubr.f32.mxu0 %v4426_v22 }
 0x121   :  { %3005 = vmatprep.subr.bf16.mxu0 %v3772_v40  ;;  %2700 = vmatmul.mubr.f32.vlgmr.msra.gmra.mrb[2].mxu1 %v3927_v35 }
 0x122   :  { %3035 = vmatpush1.bf16.msra.mxu1 %v3932_v57  ;;  %1137 = vmatprep.mubr.f32.mxu1 %v4426_v22 }
 0x123   :  { %3037 = vmatprep.subr.bf16.mxu1 %v3935_v59 }
 0x124   :  { %3007 = vmatpush1.bf16.msra.mxu0 %v3835_v21 }
 0x125   :  { %3009 = vmatprep.subr.bf16.mxu0 %v3774_v41 }
 0x126   :  { %3039 = vmatpush1.bf16.msra.mxu1 %v3938_v32 }
 0x127   :  { %3041 = vmatprep.subr.bf16.mxu1 %v3942_v4 }
 0x128   :  { %3011 = vmatpush1.bf16.msra.mxu0 %v3848_v0 }
 0x129   :  { %3013 = vmatprep.subr.bf16.mxu0 %v3776_v42 }
 0x12a   :  { %3043 = vmatpush1.bf16.msra.mxu1 %v3945_v6 }
 0x12b   :  { %3045 = vmatprep.subr.bf16.mxu1 %v3948_v10 }
 0x12c   :  { %3015 = vmatpush1.bf16.msra.mxu0 %v3863_v45 }
 0x12d   :  { %3017 = vmatprep.subr.bf16.mxu0 %v3780_v46 }
 0x12e   :  { %3047 = vmatpush1.bf16.msra.mxu1 %v3951_v14 }
 0x12f   :  { %3049 = vmatprep.subr.bf16.mxu1 %v3954_v63 }
 0x130   :  { %3019 = vmatpush1.bf16.msra.mxu0 %v3876_v15 }
 0x131   :  { %3021 = vmatprep.subr.bf16.mxu0 %v3782_v47 }
 0x132   :  { %3051 = vmatpush1.bf16.msra.mxu1 %v3957_v23 }
 0x133   :  { %3053 = vmatprep.subr.bf16.mxu1 %v3960_v27 }
 0x134   :  { %3023 = vmatpush1.bf16.msra.mxu0 %v3886_v60 }
 0x135   :  { %3025 = vmatprep.subr.bf16.mxu0 %v3791_v55 }
 0x136   :  { %3055 = vmatpush1.bf16.msra.mxu1 %v3963_v36 }
 0x137   :  { %3057 = vmatprep.subr.bf16.mxu1 %v3966_v37 }
 0x138   :  { %3027 = vmatpush1.bf16.msra.mxu0 %v3908_v17 }
 0x139   :  { %3029 = vmatprep.subr.bf16.mxu0 %v3793_v56 }
 0x13a   :  { %3059 = vmatpush1.bf16.msra.mxu1 %v3969_v38 }
 0x13b   :  { %3061 = vmatprep.subr.bf16.mxu1 %v3972_v48 }
 0x13c   :  { %3031 = vmatpush1.bf16.msra.mxu0 %v3919_v30 }
 0x13d   :  { %3064 = vmatprep.subr.bf16.mxu0 %v4428_v61 }
 0x13e   :  { %3063 = vmatpush1.bf16.msra.mxu1 %v3975_v54 }
 0x13f   :  { %3089 = vmatprep.subr.bf16.mxu1 %v3744_v19 }
 0x1c8   :  { %v817_v11 = vpop.f32.mrb[0].mxu1 }
 0x1c9   :  { %v819_v51 = vpop.f32.mrb[1].mxu1 }
 0x1d2   :  { %v613_v44 = vpop.f32.mrb[0].mxu0 }
 0x1d3   :  { %v2539_v52 = vmul.f32 -1.442695, %v613_v44  ;;  %v2666_v53 = vpop.f32.mrb[1].mxu0 }
 0x1d5   :  { %3569 = vpow2.f32 %v2539_v52 }
 0x1df   :  { %v3570_v58 = vpop.eup %3569 }
 0x1e0   :  { %v620_v1 = vadd.f32 1.0, %v3570_v58 }
 0x1e2   :  { %3571 = vrcp.f32 %v620_v1 }
 0x1ec   :  { %v3572_v2 = vpop.eup %3571 }
 0x1ed   :  { %v623_v3 = vmul.f32 2.0, %v3572_v2 }
 0x1ef   :  { %v2540_v5 = vadd.f32 -1.0, %v623_v3 }
 0x1f1   :  { %640 = vrot.lane.b32.xlu1 %v2540_v5, %s3664_s10  ;;  %660 = vrot.lane.b32.xlu0 %v2540_v5, %s3665_s11  ;;  %v632_v49 = vmul.f32 %v2540_v5, %v625_v7 }
 0x1f2   :  { %v888_v39 = vpop.f32.mrb[2].mxu0 }
 0x1f3   :  { %v890_v53 = vpop.f32.mrb[3].mxu0 }
 0x1f4   :  { %v959_v58 = vpop.f32.mrb[2].mxu1 }
 0x1f5   :  { %650 = vrot.lane.b32.xlu1 %v2540_v5, %s3666_s12  ;;  %635 = vperm.xlu0 %3560, %v632_v49   ;;  %v2701_v1 = vpop.f32.mrb[3].mxu1  ;;  %v4053_v49 = vsub.s32 1, %v3738_v9 }
 0x1f7   :  { %4451 = vst [vmem:[#allocation18_spill] sm:$0xff] %v4053_v49 }
 0x1f9   :  { %628 = vperm.xlu1 %3559, %v625_v7  }
 0x263   :  { %v641_v50 = vpop.permute.xlu1 %640  ;;  %v661_v18 = vpop.permute.xlu0 %660 }
 0x264   :  { %v643_v20 = vmul.f32 %v641_v50, %v625_v7  ;;  %v663_v33 = vmul.f32 %v661_v18, %v625_v7 }
 0x266   :  { %646 = vperm.xlu1 %3559, %v643_v20   ;;  %666 = vperm.xlu0 %3560, %v663_v33   ;;  %v4059_v33 = vsub.s32 3, %v3738_v9 }
 0x267   :  { %v651_v29 = vpop.permute.xlu1 %650 }
 0x268   :  { %v653_v34 = vmul.f32 %v651_v29, %v625_v7  ;;  %v4056_v7 = vsub.s32 2, %v3738_v9 }
 0x26a   :  { %656 = vperm.xlu1 %3559, %v653_v34   ;;  %4452 = vst [vmem:[#allocation19_spill] sm:$0xff] %v4056_v7 }
 0x274   :  { %v636_v44 = vpop.permute.xlu0 %635 }
 0x275   :  { %638 = vst [vmem:[#allocation3 + $0x8] sm:$0xff] %v636_v44 }
 0x278   :  { %v629_v52 = vpop.permute.xlu1 %628 }
 0x279   :  { %631 = vst [vmem:[#allocation3] sm:$0xff] %v629_v52  ;;  %v4065_v52 = vsub.s32 4, %v3738_v9  ;;  %v4453_v9 = vmov 0.0|0.0  }
 0x2e5   :  { %v647_v2 = vpop.permute.xlu1 %646  ;;  %v667_v3 = vpop.permute.xlu0 %666 }
 0x2e6   :  { %649 = vst [vmem:[#allocation3 + $0x10] sm:$0xff] %v647_v2  ;;  %669 = vst [vmem:[#allocation3 + $0x20] sm:$0xff] %v667_v3 }
 0x2e9   :  { %v657_v5 = vpop.permute.xlu1 %656 }
 0x2ea   :  { %659 = vst [vmem:[#allocation3 + $0x18] sm:$0xff] %v657_v5 }
 0x2ed   :  { %v964_v18 = vld [vmem:[#allocation3] ss:$8 sm:$0x10] }
 0x2f1   :  { %v963_v50 = vld [vmem:[#allocation3] ss:$8 sm:$0xf] }
 0x2f2   :  { %v965_v20 = vor.u32 %v964_v18, %v963_v50 }
 0x2f4   :  { %v970_v29 = vrot.slane %v965_v20, %v3741_v12  ;;  %v974_v34 = vrot.slane %v965_v20, %v4053_v49  ;;  %v978_v44 = vrot.slane %v965_v20, %v4056_v7  ;;  %v982_v3 = vrot.slane %v965_v20, %v4059_v33 }
 0x2f5   :  { %v986_v50 = vrot.slane %v965_v20, %v4065_v52  ;;  %v4458_v20 = vld [vmem:[#allocation18_spill] sm:$0xff] }
 0x2f6   :  { %v992_v1 = vmul.f32 %v970_v29, %v817_v11  ;;  %v993_v2 = vmul.f32 %v974_v34, %v819_v51  ;;  %v994_v5 = vmul.f32 %v978_v44, %v888_v39  ;;  %v995_v61 = vmul.f32 %v982_v3, %v890_v53  ;;  %v4457_v11 = vld [vmem:[#allocation13_spill] sm:$0xff] }
 0x2f7   :  { %v996_v54 = vmul.f32 %v986_v50, %v959_v58 }
 0x2f8   :  { %v997_v22 = vadd.f32 %v993_v2, %v992_v1 }
 0x2fa   :  { %v998_v18 = vadd.f32 %v997_v22, %v994_v5  ;;  %v4454_v22 = vmov 0.0  }
 0x2fc   :  { %v999_v19 = vadd.f32 %v998_v18, %v995_v61 }
 0x2fe   :  { %v1000_v12 = vadd.f32 %v999_v19, %v996_v54  ;;  %v4456_v19 = vld [vmem:[#allocation14_spill] sm:$0xff]  ;;  %v1216_v54 = vld [vmem:[#allocation3 + $0x1] ss:$8 sm:$0x10] }
 0x300   :  { %v4070_v49 = vadd.f32 %v1000_v12, %v3927_v35  ;;  %v4455_v12 = vld [vmem:[#allocation17_spill] sm:$0xff] }
 0x301   :  { %v1215_v35 = vld [vmem:[#allocation3 + $0x1] ss:$8 sm:$0xf] }
 0x302   :  { %1067 = vmatmul.mubr.f32.vlgmr.msra.gmra.mrb[4].mxu0 %v4070_v49  ;;  %1138 = vmatmul.mubr.f32.vlgmr.msra.gmra.mrb[4].mxu1 %v4070_v49  ;;  %v1217_v61 = vor.u32 %v1216_v54, %v1215_v35 }
 0x303   :  { %3066 = vmatpush3.bf16.msra.mxu0 %v3998_v62  ;;  %3091 = vmatpush1.bf16.msra.mxu1 %v3832_v16 }
 0x304   :  { %3067 = vmatprep.subr.bf16.mxu0 %v4453_v9  ;;  %3093 = vmatprep.subr.bf16.mxu1 %v3772_v40  ;;  %v1222_v51 = vrot.slane %v1217_v61, %v4457_v11  ;;  %v1230_v39 = vrot.slane %v1217_v61, %v4056_v7  ;;  %v1226_v29 = vrot.slane %v1217_v61, %v4458_v20 }
 0x305   :  { %2734 = vmatprep.mubr.msk.f32.mxu0 %vm3656_vm1, %v4454_v22  ;;  %1318 = vmatprep.mubr.f32.mxu1 %v4454_v22  ;;  %v1234_v34 = vrot.slane %v1217_v61, %v4059_v33  ;;  %v1238_v35 = vrot.slane %v1217_v61, %v4065_v52  ;;  %v1468_v61 = vld [vmem:[#allocation3 + $0x2] ss:$8 sm:$0x10] }
 0x307   :  { %3069 = vmatpush3.bf16.msra.mxu0 %v4002_v28  ;;  %3095 = vmatpush1.bf16.msra.mxu1 %v3835_v21 }
 0x308   :  { %3070 = vmatprep.subr.bf16.mxu0 %v4453_v9  ;;  %3097 = vmatprep.subr.bf16.mxu1 %v3774_v41 }
 0x30b   :  { %3072 = vmatpush3.bf16.msra.mxu0 %v4006_v8  ;;  %3099 = vmatpush1.bf16.msra.mxu1 %v3848_v0 }
 0x30c   :  { %3073 = vmatprep.subr.bf16.mxu0 %v4453_v9  ;;  %3101 = vmatprep.subr.bf16.mxu1 %v3776_v42 }
 0x30f   :  { %3075 = vmatpush3.bf16.msra.mxu0 %v4010_v13  ;;  %3103 = vmatpush1.bf16.msra.mxu1 %v3863_v45 }
 0x310   :  { %3076 = vmatprep.subr.bf16.mxu0 %v4453_v9  ;;  %3105 = vmatprep.subr.bf16.mxu1 %v3780_v46 }
 0x313   :  { %3078 = vmatpush3.bf16.msra.mxu0 %v4014_v25  ;;  %3107 = vmatpush1.bf16.msra.mxu1 %v3876_v15 }
 0x314   :  { %3079 = vmatprep.subr.bf16.mxu0 %v4453_v9  ;;  %3109 = vmatprep.subr.bf16.mxu1 %v3782_v47 }
 0x317   :  { %3081 = vmatpush3.bf16.msra.mxu0 %v4018_v26  ;;  %3111 = vmatpush1.bf16.msra.mxu1 %v3886_v60 }
 0x318   :  { %3082 = vmatprep.subr.bf16.mxu0 %v4453_v9  ;;  %3113 = vmatprep.subr.bf16.mxu1 %v3791_v55 }
 0x31b   :  { %3084 = vmatpush3.bf16.msra.mxu0 %v4022_v31  ;;  %3115 = vmatpush1.bf16.msra.mxu1 %v3908_v17 }
 0x31c   :  { %3085 = vmatprep.subr.bf16.mxu0 %v4453_v9  ;;  %3117 = vmatprep.subr.bf16.mxu1 %v3793_v56 }
 0x31f   :  { %3087 = vmatpush3.bf16.msra.mxu0 %v4026_v43  ;;  %3119 = vmatpush1.bf16.msra.mxu1 %v3919_v30 }
 0x320   :  { %3121 = vmatprep.subr.bf16.mxu0 %v3753_v24  ;;  %3152 = vmatprep.subr.bf16.mxu1 %v4453_v9 }
 0x322   :  { %2735 = vmatmul.mubr.f32.vlgmr.msra.gmra.mrb[6].mxu0 %v4070_v49 }
 0x323   :  { %3123 = vmatpush1.bf16.msra.mxu0 %v3932_v57  ;;  %1389 = vmatprep.mubr.f32.mxu0 %v4454_v22 }
 0x324   :  { %3125 = vmatprep.subr.bf16.mxu0 %v3935_v59 }
 0x327   :  { %3127 = vmatpush1.bf16.msra.mxu0 %v3938_v32 }
 0x328   :  { %3129 = vmatprep.subr.bf16.mxu0 %v3942_v4 }
 0x32b   :  { %3131 = vmatpush1.bf16.msra.mxu0 %v3945_v6 }
 0x32c   :  { %3133 = vmatprep.subr.bf16.mxu0 %v3948_v10 }
 0x32f   :  { %3135 = vmatpush1.bf16.msra.mxu0 %v3951_v14 }
 0x330   :  { %3137 = vmatprep.subr.bf16.mxu0 %v3954_v63 }
 0x333   :  { %3139 = vmatpush1.bf16.msra.mxu0 %v3957_v23 }
 0x334   :  { %3141 = vmatprep.subr.bf16.mxu0 %v3960_v27 }
 0x337   :  { %3143 = vmatpush1.bf16.msra.mxu0 %v3963_v36 }
 0x338   :  { %3145 = vmatprep.subr.bf16.mxu0 %v3966_v37 }
 0x33b   :  { %3147 = vmatpush1.bf16.msra.mxu0 %v3969_v38 }
 0x33c   :  { %3149 = vmatprep.subr.bf16.mxu0 %v3972_v48 }
 0x33f   :  { %3151 = vmatpush1.bf16.msra.mxu0 %v4455_v12 }
 0x340   :  { %3177 = vmatprep.subr.bf16.mxu0 %v4456_v19 }
 0x3d5   :  { %v1068_v53 = vpop.f32.mrb[4].mxu0  ;;  %v1139_v58 = vpop.f32.mrb[4].mxu1 }
 0x3d6   :  { %v1244_v44 = vmul.f32 %v1222_v51, %v1068_v53  ;;  %v1246_v1 = vmul.f32 %v1230_v39, %v1139_v58  ;;  %v1070_v2 = vpop.f32.mrb[5].mxu0  ;;  %v1141_v3 = vpop.f32.mrb[5].mxu1  ;;  %v4463_v51 = vld [vmem:[#allocation13_spill] sm:$0xff]  ;;  %v4464_v53 = vld [vmem:[#allocation19_spill] sm:$0xff] }
 0x3d7   :  { %v1245_v5 = vmul.f32 %v1226_v29, %v1070_v2  ;;  %v1247_v50 = vmul.f32 %v1234_v34, %v1141_v3 }
 0x3d9   :  { %v1249_v18 = vadd.f32 %v1245_v5, %v1244_v44 }
 0x3db   :  { %v1250_v19 = vadd.f32 %v1249_v18, %v1246_v1 }
 0x3dd   :  { %v1251_v12 = vadd.f32 %v1250_v19, %v1247_v50  ;;  %v1467_v19 = vld [vmem:[#allocation3 + $0x2] ss:$8 sm:$0xf] }
 0x3f5   :  { %v1210_v54 = vpop.f32.mrb[6].mxu0 }
 0x3f6   :  { %v1248_v11 = vmul.f32 %v1238_v35, %v1210_v54  ;;  %v2736_v7 = vpop.f32.mrb[7].mxu0 }
 0x3f7   :  { %v4461_v7 = vld [vmem:[#allocation17_spill] sm:$0xff] }
 0x3f8   :  { %v1252_v48 = vadd.f32 %v1251_v12, %v1248_v11  ;;  %v4462_v12 = vld [vmem:[#allocation14_spill] sm:$0xff]  ;;  %v1469_v11 = vor.u32 %v1468_v61, %v1467_v19 }
 0x3fa   :  { %v4133_v38 = vadd.f32 %v1252_v48, %v4070_v49  ;;  %v4459_v48 = vld [vmem:[#allocation15_spill] sm:$0xff]  ;;  %v4460_v49 = vld [vmem:[#allocation16_spill] sm:$0xff]  ;;  %v1474_v39 = vrot.slane %v1469_v11, %v4463_v51  ;;  %v1482_v58 = vrot.slane %v1469_v11, %v4464_v53  ;;  %v1478_v44 = vrot.slane %v1469_v11, %v4458_v20 }
 0x3fb   :  { %v1486_v1 = vrot.slane %v1469_v11, %v4059_v33  ;;  %v1490_v19 = vrot.slane %v1469_v11, %v4065_v52  ;;  %v1719_v11 = vld [vmem:[#allocation3 + $0x3] ss:$8 sm:$0xf] }
 0x3fc   :  { %1319 = vmatmul.mubr.f32.vlgmr.msra.gmra.mrb[6].mxu1 %v4133_v38  ;;  %1390 = vmatmul.mubr.f32.vlgmr.msra.gmra.mrb[8].mxu0 %v4133_v38 }
 0x3fd   :  { %3154 = vmatpush3.bf16.msra.mxu1 %v3998_v62  ;;  %3179 = vmatpush1.bf16.msra.mxu0 %v3832_v16 }
 0x3fe   :  { %3155 = vmatprep.subr.bf16.mxu1 %v4453_v9  ;;  %3181 = vmatprep.subr.bf16.mxu0 %v3772_v40 }
 0x3ff   :  { %2769 = vmatprep.mubr.msk.f32.mxu1 %vm3656_vm1, %v4454_v22  ;;  %1570 = vmatprep.mubr.f32.mxu0 %v4454_v22 }
 0x401   :  { %3157 = vmatpush3.bf16.msra.mxu1 %v4002_v28  ;;  %3183 = vmatpush1.bf16.msra.mxu0 %v3835_v21 }
 0x402   :  { %3158 = vmatprep.subr.bf16.mxu1 %v4453_v9  ;;  %3185 = vmatprep.subr.bf16.mxu0 %v3774_v41 }
 0x405   :  { %3160 = vmatpush3.bf16.msra.mxu1 %v4006_v8  ;;  %3187 = vmatpush1.bf16.msra.mxu0 %v3848_v0 }
 0x406   :  { %3161 = vmatprep.subr.bf16.mxu1 %v4453_v9  ;;  %3189 = vmatprep.subr.bf16.mxu0 %v3776_v42 }
 0x409   :  { %3163 = vmatpush3.bf16.msra.mxu1 %v4010_v13  ;;  %3191 = vmatpush1.bf16.msra.mxu0 %v3863_v45 }
 0x40a   :  { %3164 = vmatprep.subr.bf16.mxu1 %v4453_v9  ;;  %3193 = vmatprep.subr.bf16.mxu0 %v3780_v46 }
 0x40d   :  { %3166 = vmatpush3.bf16.msra.mxu1 %v4014_v25  ;;  %3195 = vmatpush1.bf16.msra.mxu0 %v3876_v15 }
 0x40e   :  { %3167 = vmatprep.subr.bf16.mxu1 %v4453_v9  ;;  %3197 = vmatprep.subr.bf16.mxu0 %v3782_v47 }
 0x411   :  { %3169 = vmatpush3.bf16.msra.mxu1 %v4018_v26  ;;  %3199 = vmatpush1.bf16.msra.mxu0 %v3886_v60 }
 0x412   :  { %3170 = vmatprep.subr.bf16.mxu1 %v4453_v9  ;;  %3201 = vmatprep.subr.bf16.mxu0 %v3791_v55 }
 0x415   :  { %3172 = vmatpush3.bf16.msra.mxu1 %v4022_v31  ;;  %3203 = vmatpush1.bf16.msra.mxu0 %v3908_v17 }
 0x416   :  { %3173 = vmatprep.subr.bf16.mxu1 %v4453_v9  ;;  %3205 = vmatprep.subr.bf16.mxu0 %v3793_v56 }
 0x419   :  { %3175 = vmatpush3.bf16.msra.mxu1 %v4026_v43  ;;  %3207 = vmatpush1.bf16.msra.mxu0 %v3919_v30 }
 0x41a   :  { %3209 = vmatprep.subr.bf16.mxu1 %v3753_v24  ;;  %3240 = vmatprep.subr.bf16.mxu0 %v4453_v9 }
 0x41c   :  { %2770 = vmatmul.mubr.f32.vlgmr.msra.gmra.mrb[8].mxu1 %v4133_v38 }
 0x41d   :  { %3211 = vmatpush1.bf16.msra.mxu1 %v3932_v57  ;;  %1641 = vmatprep.mubr.f32.mxu1 %v4454_v22 }
 0x41e   :  { %3213 = vmatprep.subr.bf16.mxu1 %v3935_v59 }
 0x421   :  { %3215 = vmatpush1.bf16.msra.mxu1 %v3938_v32 }
 0x422   :  { %3217 = vmatprep.subr.bf16.mxu1 %v3942_v4 }
 0x425   :  { %3219 = vmatpush1.bf16.msra.mxu1 %v3945_v6 }
 0x426   :  { %3221 = vmatprep.subr.bf16.mxu1 %v3948_v10 }
 0x429   :  { %3223 = vmatpush1.bf16.msra.mxu1 %v3951_v14 }
 0x42a   :  { %3225 = vmatprep.subr.bf16.mxu1 %v3954_v63 }
 0x42d   :  { %3227 = vmatpush1.bf16.msra.mxu1 %v3957_v23 }
 0x42e   :  { %3229 = vmatprep.subr.bf16.mxu1 %v3960_v27 }
 0x431   :  { %3231 = vmatpush1.bf16.msra.mxu1 %v3963_v36 }
 0x432   :  { %3233 = vmatprep.subr.bf16.mxu1 %v3966_v37 }
 0x435   :  { %3235 = vmatpush1.bf16.msra.mxu1 %v4459_v48 }
 0x436   :  { %3237 = vmatprep.subr.bf16.mxu1 %v4460_v49 }
 0x439   :  { %3239 = vmatpush1.bf16.msra.mxu1 %v4461_v7 }
 0x43a   :  { %3265 = vmatprep.subr.bf16.mxu1 %v4462_v12 }
 0x4cf   :  { %v1320_v29 = vpop.f32.mrb[6].mxu1  ;;  %v1391_v34 = vpop.f32.mrb[8].mxu0 }
 0x4d0   :  { %v1496_v2 = vmul.f32 %v1474_v39, %v1320_v29  ;;  %v1498_v3 = vmul.f32 %v1482_v58, %v1391_v34  ;;  %v1322_v5 = vpop.f32.mrb[7].mxu1  ;;  %v1393_v50 = vpop.f32.mrb[9].mxu0  ;;  %v4470_v29 = vld [vmem:[#allocation19_spill] sm:$0xff] }
 0x4d1   :  { %v1497_v18 = vmul.f32 %v1478_v44, %v1322_v5  ;;  %v1499_v35 = vmul.f32 %v1486_v1, %v1393_v50 }
 0x4d3   :  { %v1501_v54 = vadd.f32 %v1497_v18, %v1496_v2 }
 0x4d5   :  { %v1502_v12 = vadd.f32 %v1501_v54, %v1498_v3 }
 0x4d7   :  { %v1503_v7 = vadd.f32 %v1502_v12, %v1499_v35  ;;  %v4468_v12 = vld [vmem:[#allocation14_spill] sm:$0xff] }
 0x4ef   :  { %v1462_v61 = vpop.f32.mrb[8].mxu1 }
 0x4f0   :  { %v1500_v51 = vmul.f32 %v1490_v19, %v1462_v61  ;;  %v2771_v53 = vpop.f32.mrb[9].mxu1 }
 0x4f1   :  { %v4469_v53 = vld [vmem:[#allocation13_spill] sm:$0xff] }
 0x4f2   :  { %v1504_v49 = vadd.f32 %v1503_v7, %v1500_v51  ;;  %v4467_v7 = vld [vmem:[#allocation17_spill] sm:$0xff]  ;;  %v1720_v51 = vld [vmem:[#allocation3 + $0x3] ss:$8 sm:$0x10] }
 0x4f3   :  { %v1721_v39 = vor.u32 %v1720_v51, %v1719_v11 }
 0x4f4   :  { %v4196_v48 = vadd.f32 %v1504_v49, %v4133_v38  ;;  %v4465_v38 = vld [vmem:[#allocation15_spill] sm:$0xff]  ;;  %v4466_v49 = vld [vmem:[#allocation16_spill] sm:$0xff] }
 0x4f5   :  { %v1726_v58 = vrot.slane %v1721_v39, %v4469_v53  ;;  %v1734_v34 = vrot.slane %v1721_v39, %v4470_v29  ;;  %v1730_v2 = vrot.slane %v1721_v39, %v4458_v20  ;;  %v1738_v3 = vrot.slane %v1721_v39, %v4059_v33 }
 0x4f6   :  { %1571 = vmatmul.mubr.f32.vlgmr.msra.gmra.mrb[10].mxu0 %v4196_v48  ;;  %1642 = vmatmul.mubr.f32.vlgmr.msra.gmra.mrb[10].mxu1 %v4196_v48  ;;  %v1742_v11 = vrot.slane %v1721_v39, %v4065_v52  ;;  %v1971_v39 = vld [vmem:[#allocation3 + $0x4] ss:$8 sm:$0xf] }
 0x4f7   :  { %3242 = vmatpush3.bf16.msra.mxu0 %v3998_v62  ;;  %3267 = vmatpush1.bf16.msra.mxu1 %v3832_v16 }
 0x4f8   :  { %3243 = vmatprep.subr.bf16.mxu0 %v4453_v9  ;;  %3269 = vmatprep.subr.bf16.mxu1 %v3772_v40 }
 0x4f9   :  { %2804 = vmatprep.mubr.msk.f32.mxu0 %vm3656_vm1, %v4454_v22  ;;  %1822 = vmatprep.mubr.f32.mxu1 %v4454_v22 }
 0x4fb   :  { %3245 = vmatpush3.bf16.msra.mxu0 %v4002_v28  ;;  %3271 = vmatpush1.bf16.msra.mxu1 %v3835_v21 }
 0x4fc   :  { %3246 = vmatprep.subr.bf16.mxu0 %v4453_v9  ;;  %3273 = vmatprep.subr.bf16.mxu1 %v3774_v41 }
 0x4ff   :  { %3248 = vmatpush3.bf16.msra.mxu0 %v4006_v8  ;;  %3275 = vmatpush1.bf16.msra.mxu1 %v3848_v0 }
 0x500   :  { %3249 = vmatprep.subr.bf16.mxu0 %v4453_v9  ;;  %3277 = vmatprep.subr.bf16.mxu1 %v3776_v42 }
 0x503   :  { %3251 = vmatpush3.bf16.msra.mxu0 %v4010_v13  ;;  %3279 = vmatpush1.bf16.msra.mxu1 %v3863_v45 }
 0x504   :  { %3252 = vmatprep.subr.bf16.mxu0 %v4453_v9  ;;  %3281 = vmatprep.subr.bf16.mxu1 %v3780_v46 }
 0x507   :  { %3254 = vmatpush3.bf16.msra.mxu0 %v4014_v25  ;;  %3283 = vmatpush1.bf16.msra.mxu1 %v3876_v15 }
 0x508   :  { %3255 = vmatprep.subr.bf16.mxu0 %v4453_v9  ;;  %3285 = vmatprep.subr.bf16.mxu1 %v3782_v47 }
 0x50b   :  { %3257 = vmatpush3.bf16.msra.mxu0 %v4018_v26  ;;  %3287 = vmatpush1.bf16.msra.mxu1 %v3886_v60 }
 0x50c   :  { %3258 = vmatprep.subr.bf16.mxu0 %v4453_v9  ;;  %3289 = vmatprep.subr.bf16.mxu1 %v3791_v55 }
 0x50f   :  { %3260 = vmatpush3.bf16.msra.mxu0 %v4022_v31  ;;  %3291 = vmatpush1.bf16.msra.mxu1 %v3908_v17 }
 0x510   :  { %3261 = vmatprep.subr.bf16.mxu0 %v4453_v9  ;;  %3293 = vmatprep.subr.bf16.mxu1 %v3793_v56 }
 0x513   :  { %3263 = vmatpush3.bf16.msra.mxu0 %v4026_v43  ;;  %3295 = vmatpush1.bf16.msra.mxu1 %v3919_v30 }
 0x514   :  { %3297 = vmatprep.subr.bf16.mxu0 %v3753_v24  ;;  %3328 = vmatprep.subr.bf16.mxu1 %v4453_v9 }
 0x516   :  { %2805 = vmatmul.mubr.f32.vlgmr.msra.gmra.mrb[12].mxu0 %v4196_v48 }
 0x517   :  { %3299 = vmatpush1.bf16.msra.mxu0 %v3932_v57  ;;  %1893 = vmatprep.mubr.f32.mxu0 %v4454_v22 }
 0x518   :  { %3301 = vmatprep.subr.bf16.mxu0 %v3935_v59 }
 0x51b   :  { %3303 = vmatpush1.bf16.msra.mxu0 %v3938_v32 }
 0x51c   :  { %3305 = vmatprep.subr.bf16.mxu0 %v3942_v4 }
 0x51f   :  { %3307 = vmatpush1.bf16.msra.mxu0 %v3945_v6 }
 0x520   :  { %3309 = vmatprep.subr.bf16.mxu0 %v3948_v10 }
 0x523   :  { %3311 = vmatpush1.bf16.msra.mxu0 %v3951_v14 }
 0x524   :  { %3313 = vmatprep.subr.bf16.mxu0 %v3954_v63 }
 0x527   :  { %3315 = vmatpush1.bf16.msra.mxu0 %v3957_v23 }
 0x528   :  { %3317 = vmatprep.subr.bf16.mxu0 %v3960_v27 }
 0x52b   :  { %3319 = vmatpush1.bf16.msra.mxu0 %v3963_v36 }
 0x52c   :  { %3321 = vmatprep.subr.bf16.mxu0 %v3966_v37 }
 0x52f   :  { %3323 = vmatpush1.bf16.msra.mxu0 %v4465_v38 }
 0x530   :  { %3325 = vmatprep.subr.bf16.mxu0 %v4466_v49 }
 0x533   :  { %3327 = vmatpush1.bf16.msra.mxu0 %v4467_v7 }
 0x534   :  { %3353 = vmatprep.subr.bf16.mxu0 %v4468_v12 }
 0x5c9   :  { %v1572_v44 = vpop.f32.mrb[10].mxu0  ;;  %v1643_v1 = vpop.f32.mrb[10].mxu1 }
 0x5ca   :  { %v1748_v5 = vmul.f32 %v1726_v58, %v1572_v44  ;;  %v1750_v50 = vmul.f32 %v1734_v34, %v1643_v1  ;;  %v1574_v18 = vpop.f32.mrb[11].mxu0  ;;  %v1645_v35 = vpop.f32.mrb[11].mxu1  ;;  %v4476_v44 = vld [vmem:[#allocation19_spill] sm:$0xff] }
 0x5cb   :  { %v1749_v54 = vmul.f32 %v1730_v2, %v1574_v18  ;;  %v1751_v19 = vmul.f32 %v1738_v3, %v1645_v35 }
 0x5cd   :  { %v1753_v61 = vadd.f32 %v1749_v54, %v1748_v5 }
 0x5cf   :  { %v1754_v12 = vadd.f32 %v1753_v61, %v1750_v50 }
 0x5d1   :  { %v1755_v7 = vadd.f32 %v1754_v12, %v1751_v19  ;;  %v4474_v12 = vld [vmem:[#allocation14_spill] sm:$0xff] }
 0x5e9   :  { %v1714_v51 = vpop.f32.mrb[12].mxu0 }
 0x5ea   :  { %v1752_v53 = vmul.f32 %v1742_v11, %v1714_v51  ;;  %v2806_v29 = vpop.f32.mrb[13].mxu0 }
 0x5eb   :  { %v4475_v29 = vld [vmem:[#allocation13_spill] sm:$0xff] }
 0x5ec   :  { %v1756_v49 = vadd.f32 %v1755_v7, %v1752_v53  ;;  %v4473_v7 = vld [vmem:[#allocation17_spill] sm:$0xff]  ;;  %v1972_v53 = vld [vmem:[#allocation3 + $0x4] ss:$8 sm:$0x10] }
 0x5ed   :  { %v1973_v58 = vor.u32 %v1972_v53, %v1971_v39 }
 0x5ee   :  { %v4259_v38 = vadd.f32 %v1756_v49, %v4196_v48  ;;  %v4471_v48 = vld [vmem:[#allocation15_spill] sm:$0xff]  ;;  %v4472_v49 = vld [vmem:[#allocation16_spill] sm:$0xff] }
 0x5ef   :  { %v1978_v34 = vrot.slane %v1973_v58, %v4475_v29  ;;  %v1986_v1 = vrot.slane %v1973_v58, %v4476_v44  ;;  %v1982_v5 = vrot.slane %v1973_v58, %v4458_v20  ;;  %v1990_v50 = vrot.slane %v1973_v58, %v4059_v33 }
 0x5f0   :  { %1823 = vmatmul.mubr.f32.vlgmr.msra.gmra.mrb[12].mxu1 %v4259_v38  ;;  %1894 = vmatmul.mubr.f32.vlgmr.msra.gmra.mrb[14].mxu0 %v4259_v38  ;;  %v1994_v39 = vrot.slane %v1973_v58, %v4065_v52 }
 0x5f1   :  { %3330 = vmatpush3.bf16.msra.mxu1 %v3998_v62  ;;  %3355 = vmatpush1.bf16.msra.mxu0 %v3832_v16 }
 0x5f2   :  { %3331 = vmatprep.subr.bf16.mxu1 %v4453_v9  ;;  %3357 = vmatprep.subr.bf16.mxu0 %v3772_v40 }
 0x5f3   :  { %2839 = vmatprep.mubr.msk.f32.mxu1 %vm3656_vm1, %v4454_v22  ;;  %2074 = vmatprep.mubr.f32.mxu0 %v4454_v22 }
 0x5f5   :  { %3333 = vmatpush3.bf16.msra.mxu1 %v4002_v28  ;;  %3359 = vmatpush1.bf16.msra.mxu0 %v3835_v21 }
 0x5f6   :  { %3334 = vmatprep.subr.bf16.mxu1 %v4453_v9  ;;  %3361 = vmatprep.subr.bf16.mxu0 %v3774_v41 }
 0x5f9   :  { %3336 = vmatpush3.bf16.msra.mxu1 %v4006_v8  ;;  %3363 = vmatpush1.bf16.msra.mxu0 %v3848_v0 }
 0x5fa   :  { %3337 = vmatprep.subr.bf16.mxu1 %v4453_v9  ;;  %3365 = vmatprep.subr.bf16.mxu0 %v3776_v42 }
 0x5fd   :  { %3339 = vmatpush3.bf16.msra.mxu1 %v4010_v13  ;;  %3367 = vmatpush1.bf16.msra.mxu0 %v3863_v45 }
 0x5fe   :  { %3340 = vmatprep.subr.bf16.mxu1 %v4453_v9  ;;  %3369 = vmatprep.subr.bf16.mxu0 %v3780_v46 }
 0x601   :  { %3342 = vmatpush3.bf16.msra.mxu1 %v4014_v25  ;;  %3371 = vmatpush1.bf16.msra.mxu0 %v3876_v15 }
 0x602   :  { %3343 = vmatprep.subr.bf16.mxu1 %v4453_v9  ;;  %3373 = vmatprep.subr.bf16.mxu0 %v3782_v47 }
 0x605   :  { %3345 = vmatpush3.bf16.msra.mxu1 %v4018_v26  ;;  %3375 = vmatpush1.bf16.msra.mxu0 %v3886_v60 }
 0x606   :  { %3346 = vmatprep.subr.bf16.mxu1 %v4453_v9  ;;  %3377 = vmatprep.subr.bf16.mxu0 %v3791_v55 }
 0x609   :  { %3348 = vmatpush3.bf16.msra.mxu1 %v4022_v31  ;;  %3379 = vmatpush1.bf16.msra.mxu0 %v3908_v17 }
 0x60a   :  { %3349 = vmatprep.subr.bf16.mxu1 %v4453_v9  ;;  %3381 = vmatprep.subr.bf16.mxu0 %v3793_v56 }
 0x60d   :  { %3351 = vmatpush3.bf16.msra.mxu1 %v4026_v43  ;;  %3383 = vmatpush1.bf16.msra.mxu0 %v3919_v30 }
 0x60e   :  { %3385 = vmatprep.subr.bf16.mxu1 %v3753_v24  ;;  %3416 = vmatprep.subr.bf16.mxu0 %v4453_v9 }
 0x610   :  { %2840 = vmatmul.mubr.f32.vlgmr.msra.gmra.mrb[14].mxu1 %v4259_v38 }
 0x611   :  { %3387 = vmatpush1.bf16.msra.mxu1 %v3932_v57  ;;  %2145 = vmatprep.mubr.f32.mxu1 %v4454_v22 }
 0x612   :  { %3389 = vmatprep.subr.bf16.mxu1 %v3935_v59 }
 0x615   :  { %3391 = vmatpush1.bf16.msra.mxu1 %v3938_v32 }
 0x616   :  { %3393 = vmatprep.subr.bf16.mxu1 %v3942_v4 }
 0x619   :  { %3395 = vmatpush1.bf16.msra.mxu1 %v3945_v6 }
 0x61a   :  { %3397 = vmatprep.subr.bf16.mxu1 %v3948_v10 }
 0x61d   :  { %3399 = vmatpush1.bf16.msra.mxu1 %v3951_v14 }
 0x61e   :  { %3401 = vmatprep.subr.bf16.mxu1 %v3954_v63 }
 0x621   :  { %3403 = vmatpush1.bf16.msra.mxu1 %v3957_v23 }
 0x622   :  { %3405 = vmatprep.subr.bf16.mxu1 %v3960_v27 }
 0x625   :  { %3407 = vmatpush1.bf16.msra.mxu1 %v3963_v36 }
 0x626   :  { %3409 = vmatprep.subr.bf16.mxu1 %v3966_v37 }
 0x629   :  { %3411 = vmatpush1.bf16.msra.mxu1 %v4471_v48 }
 0x62a   :  { %3413 = vmatprep.subr.bf16.mxu1 %v4472_v49 }
 0x62d   :  { %3415 = vmatpush1.bf16.msra.mxu1 %v4473_v7 }
 0x62e   :  { %3441 = vmatprep.subr.bf16.mxu1 %v4474_v12 }
 0x6c3   :  { %v1824_v2 = vpop.f32.mrb[12].mxu1  ;;  %v1895_v3 = vpop.f32.mrb[14].mxu0 }
 0x6c4   :  { %v2000_v18 = vmul.f32 %v1978_v34, %v1824_v2  ;;  %v2002_v35 = vmul.f32 %v1986_v1, %v1895_v3  ;;  %v1826_v54 = vpop.f32.mrb[13].mxu1  ;;  %v1897_v19 = vpop.f32.mrb[15].mxu0 }
 0x6c5   :  { %v2001_v61 = vmul.f32 %v1982_v5, %v1826_v54  ;;  %v2003_v11 = vmul.f32 %v1990_v50, %v1897_v19 }
 0x6c7   :  { %v2005_v51 = vadd.f32 %v2001_v61, %v2000_v18 }
 0x6c9   :  { %v2006_v12 = vadd.f32 %v2005_v51, %v2002_v35 }
 0x6cb   :  { %v2007_v7 = vadd.f32 %v2006_v12, %v2003_v11 }
 0x6e3   :  { %v1966_v53 = vpop.f32.mrb[14].mxu1 }
 0x6e4   :  { %v2004_v29 = vmul.f32 %v1994_v39, %v1966_v53  ;;  %v2841_v44 = vpop.f32.mrb[15].mxu1 }
 0x6e6   :  { %v2008_v49 = vadd.f32 %v2007_v7, %v2004_v29 }
 0x6e8   :  { %v4322_v48 = vadd.f32 %v2008_v49, %v4259_v38 }
 0x6ea   :  { %2075 = vmatmul.mubr.f32.vlgmr.msra.gmra.mrb[16].mxu0 %v4322_v48  ;;  %2146 = vmatmul.mubr.f32.vlgmr.msra.gmra.mrb[16].mxu1 %v4322_v48 }
 0x6eb   :  { %3418 = vmatpush3.bf16.msra.mxu0 %v3998_v62  ;;  %3443 = vmatpush1.bf16.msra.mxu1 %v3832_v16  ;;  %v4481_v16 = vld [vmem:[#allocation19_spill] sm:$0xff] }
 0x6ec   :  { %3419 = vmatprep.subr.bf16.mxu0 %v4453_v9  ;;  %3445 = vmatprep.subr.bf16.mxu1 %v3772_v40  ;;  %v4478_v40 = vld [vmem:[#allocation16_spill] sm:$0xff] }
 0x6ed   :  { %2874 = vmatprep.mubr.msk.f32.mxu0 %vm3656_vm1, %v4454_v22  ;;  %2326 = vmatprep.mubr.f32.mxu1 %v4454_v22 }
 0x6ef   :  { %3421 = vmatpush3.bf16.msra.mxu0 %v4002_v28  ;;  %3447 = vmatpush1.bf16.msra.mxu1 %v3835_v21 }
 0x6f0   :  { %3422 = vmatprep.subr.bf16.mxu0 %v4453_v9  ;;  %3449 = vmatprep.subr.bf16.mxu1 %v3774_v41  ;;  %v4479_v41 = vld [vmem:[#allocation17_spill] sm:$0xff] }
 0x6f3   :  { %3424 = vmatpush3.bf16.msra.mxu0 %v4006_v8  ;;  %3451 = vmatpush1.bf16.msra.mxu1 %v3848_v0 }
 0x6f4   :  { %3425 = vmatprep.subr.bf16.mxu0 %v4453_v9  ;;  %3453 = vmatprep.subr.bf16.mxu1 %v3776_v42  ;;  %v2223_v42 = vld [vmem:[#allocation3 + $0x5] ss:$8 sm:$0xf] }
 0x6f7   :  { %3427 = vmatpush3.bf16.msra.mxu0 %v4010_v13  ;;  %3455 = vmatpush1.bf16.msra.mxu1 %v3863_v45 }
 0x6f8   :  { %3428 = vmatprep.subr.bf16.mxu0 %v4453_v9  ;;  %3457 = vmatprep.subr.bf16.mxu1 %v3780_v46  ;;  %v2224_v46 = vld [vmem:[#allocation3 + $0x5] ss:$8 sm:$0x10] }
 0x6fb   :  { %3430 = vmatpush3.bf16.msra.mxu0 %v4014_v25  ;;  %3459 = vmatpush1.bf16.msra.mxu1 %v3876_v15 }
 0x6fc   :  { %3431 = vmatprep.subr.bf16.mxu0 %v4453_v9  ;;  %3461 = vmatprep.subr.bf16.mxu1 %v3782_v47  ;;  %v2225_v47 = vor.u32 %v2224_v46, %v2223_v42 }
 0x6fe   :  { %v2238_v21 = vrot.slane %v2225_v47, %v4481_v16  ;;  %v2234_v15 = vrot.slane %v2225_v47, %v4458_v20 }
 0x6ff   :  { %3433 = vmatpush3.bf16.msra.mxu0 %v4018_v26  ;;  %3463 = vmatpush1.bf16.msra.mxu1 %v3886_v60  ;;  %v2242_v60 = vrot.slane %v2225_v47, %v4059_v33 }
 0x700   :  { %3434 = vmatprep.subr.bf16.mxu0 %v4453_v9  ;;  %3465 = vmatprep.subr.bf16.mxu1 %v3791_v55  ;;  %v4480_v55 = vld [vmem:[#allocation13_spill] sm:$0xff] }
 0x703   :  { %3436 = vmatpush3.bf16.msra.mxu0 %v4022_v31  ;;  %3467 = vmatpush1.bf16.msra.mxu1 %v3908_v17 }
 0x704   :  { %3437 = vmatprep.subr.bf16.mxu0 %v4453_v9  ;;  %3469 = vmatprep.subr.bf16.mxu1 %v3793_v56  ;;  %v2230_v56 = vrot.slane %v2225_v47, %v4480_v55 }
 0x707   :  { %3439 = vmatpush3.bf16.msra.mxu0 %v4026_v43  ;;  %3471 = vmatpush1.bf16.msra.mxu1 %v3919_v30 }
 0x708   :  { %3473 = vmatprep.subr.bf16.mxu0 %v3753_v24  ;;  %3504 = vmatprep.subr.bf16.mxu1 %v4453_v9  ;;  %v4477_v24 = vld [vmem:[#allocation15_spill] sm:$0xff] }
 0x70a   :  { %2875 = vmatmul.mubr.f32.vlgmr.msra.gmra.mrb[18].mxu0 %v4322_v48 }
 0x70b   :  { %3475 = vmatpush1.bf16.msra.mxu0 %v3932_v57  ;;  %2397 = vmatprep.mubr.f32.mxu0 %v4454_v22 }
 0x70c   :  { %3477 = vmatprep.subr.bf16.mxu0 %v3935_v59 }
 0x70f   :  { %3479 = vmatpush1.bf16.msra.mxu0 %v3938_v32 }
 0x710   :  { %3481 = vmatprep.subr.bf16.mxu0 %v3942_v4 }
 0x713   :  { %3483 = vmatpush1.bf16.msra.mxu0 %v3945_v6 }
 0x714   :  { %3485 = vmatprep.subr.bf16.mxu0 %v3948_v10 }
 0x717   :  { %3487 = vmatpush1.bf16.msra.mxu0 %v3951_v14 }
 0x718   :  { %3489 = vmatprep.subr.bf16.mxu0 %v3954_v63  ;;  %v2246_v63 = vrot.slane %v2225_v47, %v4065_v52 }
 0x71b   :  { %3491 = vmatpush1.bf16.msra.mxu0 %v3957_v23 }
 0x71c   :  { %3493 = vmatprep.subr.bf16.mxu0 %v3960_v27 }
 0x71f   :  { %3495 = vmatpush1.bf16.msra.mxu0 %v3963_v36 }
 0x720   :  { %3497 = vmatprep.subr.bf16.mxu0 %v3966_v37 }
 0x723   :  { %3499 = vmatpush1.bf16.msra.mxu0 %v4477_v24 }
 0x724   :  { %3501 = vmatprep.subr.bf16.mxu0 %v4478_v40 }
 0x727   :  { %3503 = vmatpush1.bf16.msra.mxu0 %v4479_v41 }
 0x7bd   :  { %v2076_v0 = vpop.f32.mrb[16].mxu0  ;;  %v2147_v45 = vpop.f32.mrb[16].mxu1 }
 0x7be   :  { %v2252_v17 = vmul.f32 %v2230_v56, %v2076_v0  ;;  %v2254_v30 = vmul.f32 %v2238_v21, %v2147_v45  ;;  %v2078_v57 = vpop.f32.mrb[17].mxu0  ;;  %v2149_v59 = vpop.f32.mrb[17].mxu1 }
 0x7bf   :  { %v2253_v32 = vmul.f32 %v2234_v15, %v2078_v57  ;;  %v2255_v4 = vmul.f32 %v2242_v60, %v2149_v59 }
 0x7c1   :  { %v2257_v6 = vadd.f32 %v2253_v32, %v2252_v17 }
 0x7c3   :  { %v2258_v10 = vadd.f32 %v2257_v6, %v2254_v30 }
 0x7c5   :  { %v2259_v14 = vadd.f32 %v2258_v10, %v2255_v4 }
 0x7dd   :  { %v2218_v23 = vpop.f32.mrb[18].mxu0 }
 0x7de   :  { %v2256_v27 = vmul.f32 %v2246_v63, %v2218_v23  ;;  %v2876_v36 = vpop.f32.mrb[19].mxu0 }
 0x7e0   :  { %v2260_v37 = vadd.f32 %v2259_v14, %v2256_v27 }
 0x7e2   :  { %v2261_v38 = vadd.f32 %v2260_v37, %v4322_v48 }
 0x7e4   :  { %2327 = vmatmul.mubr.f32.vlgmr.msra.gmra.mrb[18].mxu1 %v2261_v38  ;;  %2398 = vmatmul.mubr.f32.vlgmr.msra.gmra.mrb[20].mxu0 %v2261_v38 }
 0x7e5   :  { %3506 = vmatpush3.bf16.msra.mxu1 %v3998_v62  ;;  %2909 = vmatprep.mubr.msk.f32.mxu1 %vm3656_vm1, %v4454_v22  ;;  %v2475_v62 = vld [vmem:[#allocation3 + $0x6] ss:$8 sm:$0xf] }
 0x7e6   :  { %3507 = vmatprep.subr.bf16.mxu1 %v4453_v9 }
 0x7e9   :  { %3509 = vmatpush3.bf16.msra.mxu1 %v4002_v28  ;;  %v2476_v28 = vld [vmem:[#allocation3 + $0x6] ss:$8 sm:$0x10] }
 0x7ea   :  { %3510 = vmatprep.subr.bf16.mxu1 %v4453_v9 }
 0x7ed   :  { %3512 = vmatpush3.bf16.msra.mxu1 %v4006_v8  ;;  %v2477_v8 = vor.u32 %v2476_v28, %v2475_v62 }
 0x7ee   :  { %3513 = vmatprep.subr.bf16.mxu1 %v4453_v9 }
 0x7ef   :  { %v2494_v49 = vrot.slane %v2477_v8, %v4059_v33  ;;  %v2498_v2 = vrot.slane %v2477_v8, %v4065_v52 }
 0x7f1   :  { %3515 = vmatpush3.bf16.msra.mxu1 %v4010_v13  ;;  %v2482_v13 = vrot.slane %v2477_v8, %v4480_v55 }
 0x7f2   :  { %3516 = vmatprep.subr.bf16.mxu1 %v4453_v9 }
 0x7f5   :  { %3518 = vmatpush3.bf16.msra.mxu1 %v4014_v25  ;;  %v2490_v25 = vrot.slane %v2477_v8, %v4481_v16 }
 0x7f6   :  { %3519 = vmatprep.subr.bf16.mxu1 %v4453_v9 }
 0x7f9   :  { %3521 = vmatpush3.bf16.msra.mxu1 %v4018_v26  ;;  %v2486_v26 = vrot.slane %v2477_v8, %v4458_v20 }
 0x7fa   :  { %3522 = vmatprep.subr.bf16.mxu1 %v4453_v9 }
 0x7fd   :  { %3524 = vmatpush3.bf16.msra.mxu1 %v4022_v31 }
 0x7fe   :  { %3525 = vmatprep.subr.bf16.mxu1 %v4453_v9 }
 0x801   :  { %3527 = vmatpush3.bf16.msra.mxu1 %v4026_v43 }
 0x804   :  { %2910 = vmatmul.mubr.f32.vlgmr.msra.gmra.mrb[20].mxu1 %v2261_v38 }
 0x8b7   :  { %v2328_v22 = vpop.f32.mrb[18].mxu1  ;;  %v2399_v48 = vpop.f32.mrb[20].mxu0 }
 0x8b8   :  { %v2504_v7 = vmul.f32 %v2482_v13, %v2328_v22  ;;  %v2506_v31 = vmul.f32 %v2490_v25, %v2399_v48  ;;  %v2330_v58 = vpop.f32.mrb[19].mxu1  ;;  %v2401_v9 = vpop.f32.mrb[21].mxu0 }
 0x8b9   :  { %v2505_v29 = vmul.f32 %v2486_v26, %v2330_v58  ;;  %v2507_v43 = vmul.f32 %v2494_v49, %v2401_v9 }
 0x8bb   :  { %v2509_v34 = vadd.f32 %v2505_v29, %v2504_v7 }
 0x8bd   :  { %v2510_v44 = vadd.f32 %v2509_v34, %v2506_v31 }
 0x8bf   :  { %v2511_v1 = vadd.f32 %v2510_v44, %v2507_v43 }
 0x8d7   :  { %v2470_v3 = vpop.f32.mrb[20].mxu1 }
 0x8d8   :  { %v2508_v5 = vmul.f32 %v2498_v2, %v2470_v3  ;;  %v2911_v50 = vpop.f32.mrb[21].mxu1 }
 0x8da   :  { %v2512_v18 = vadd.f32 %v2511_v1, %v2508_v5 }
 0x8dc   :  { %v2513_v20 = vadd.f32 %v2512_v18, %v2261_v38 }
 0x8de   :  { %2514 = vst [vmem:[#allocation9] sm:$0x1] %v2513_v20 }
 0x8df   :  { %3628 = shalt.err (!%p3625_p6)
}
 0x8e0   :  { %s3629_s18 = scalar_lea.hbm %s4425_s7, 16 }
 0x8e1   :  { %p3630_p7 = scmp.ne.s32.totalorder %s4425_s7, %s3629_s18  ;;  %p3633_p8 = scmp.lt.u32.totalorder %s3629_s18, %s4425_s7 }
 0x8e3   :  { %p3635_p9 = pnand %p3633_p8, %p3630_p7 }
 0x8e5   :  { %3638 = shalt.err (!%p3635_p9)
}
 0x8e6   :  { %2524 = dma.vmem_to_hbm [thread:$0]  %s2522_s13, 16, %s4425_s7, [#allocation6]  }
 0x8e7   :  { %3643 = dma.done.wait [#allocation6], 16  }
 0x8e8   :  { %3644 = vsyncadd [#allocation6], 4294967280 }
 0x8e9   :  { %2528 = vsyncpa [#allocation5], 1 }
 0x8ea   :  { %2529 = vsyncpa [#allocation8], 1 }
 0x8eb   :  { %2530 = vsyncpa [#allocation6], 1 }

</bundles_post_ra>
